<compile_context>
chip_gen: v6e
topology: v6e:2x2x1
jax: 0.10.0
libtpu: 0.0.40
codegen_flags: <defaults>
</compile_context>

<pallas_src>
import functools

import jax
import jax.numpy as jnp
from jax import lax
from jax.experimental import pallas as pl
from jax.experimental.pallas import tpu as pltpu


def temporal_attention_kernel(x_q_ref, x_kv_ref, wq_ref, wkv_ref, wo_ref, o_ref,
                              q_sc, m_sc, l_sc, acc_sc, *,
                              num_heads: int, num_joints: int, token_dim: int,
                              matmul_dtype):
    D, J, H = token_dim, num_joints, num_heads
    Dh, JD, JH = D // H, J * D, J * H
    TQ = x_q_ref.shape[1]
    TK = x_kv_ref.shape[1]

    qi = pl.program_id(1)
    ki = pl.program_id(2)
    nk = pl.num_programs(2)

    def split_heads(y2d, t):
        # (t, J*D) -> (J*H, t, Dh): one packed relayout (reshape + swapaxes) instead
        # of J*H explicit width-Dh lane slices.  Done in f32 before the bf16 cast.
        return jnp.swapaxes(y2d.reshape(t, JH, Dh), 0, 1)

    # ---- per-(batch, q-tile) init: Q projection + online-softmax state ----------------
    @pl.when(ki == 0)
    def _init():
        xq = x_q_ref[0].astype(matmul_dtype)                                  # (TQ, JD)
        q = jnp.dot(xq, wq_ref[...], preferred_element_type=jnp.float32)      # scaled Q
        q_sc[...] = split_heads(q, TQ).astype(matmul_dtype)                   # (JH, TQ, Dh)
        m_sc[...] = jnp.full_like(m_sc, -1e30)          # finite lowest: no inf-inf NaNs
        l_sc[...] = jnp.zeros_like(l_sc)
        acc_sc[...] = jnp.zeros_like(acc_sc)

    # ---- causal tile skip: strictly-upper kv tiles contribute nothing -----------------
    @pl.when(ki * TK <= qi * TQ + (TQ - 1))
    def _compute():
        xkv = x_kv_ref[0].astype(matmul_dtype)                                # (TK, JD)
        kv = jnp.dot(xkv, wkv_ref[...], preferred_element_type=jnp.float32)   # (TK, 2*JD)
        k = split_heads(kv[:, :JD], TK).astype(matmul_dtype)                  # (JH, TK, Dh)
        v = split_heads(kv[:, JD:], TK).astype(matmul_dtype)                  # (JH, TK, Dh)

        # Batched (joint*head) scores for this tile; softmax math in f32.
        s = jnp.einsum('bqd,bkd->bqk', q_sc[...], k,
                       preferred_element_type=jnp.float32)                    # (JH, TQ, TK)

        # In-kernel per-tile causal mask (additive -1e9, matching the PyTorch module).
        row = qi * TQ + lax.broadcasted_iota(jnp.int32, (TQ, TK), 0)
        col = ki * TK + lax.broadcasted_iota(jnp.int32, (TQ, TK), 1)
        s = s + jnp.where(col > row, jnp.float32(-1e9), jnp.float32(0.0))

        m_prev = m_sc[...]
        m_new = jnp.maximum(m_prev, jnp.max(s, axis=-1, keepdims=True))
        alpha = jnp.exp(m_prev - m_new)
        p = jnp.exp(s - m_new)
        l_sc[...] = alpha * l_sc[...] + jnp.sum(p, axis=-1, keepdims=True)
        acc_sc[...] = alpha * acc_sc[...] + jnp.einsum(
            'bqk,bkd->bqd', p.astype(matmul_dtype), v,
            preferred_element_type=jnp.float32)                               # (JH, TQ, Dh)
        m_sc[...] = m_new

    # ---- finalize: deferred softmax normalization + output projection -----------------
    @pl.when(ki == nk - 1)
    def _finalize():
        # approx=True: EUP reciprocal; fine for forward inference at the test tolerance.
        o = acc_sc[...] * pl.reciprocal(l_sc[...], approx=True)               # (JH, TQ, Dh)
        o = jnp.swapaxes(o, 0, 1).reshape(TQ, JD)                             # merge heads
        out = jnp.dot(o.astype(matmul_dtype), wo_ref[...],
                      preferred_element_type=jnp.float32)                     # (TQ, JD)
        o_ref[0] = out.astype(o_ref.dtype)


def _block_diag(W):
    """[J, D, D] per-joint weights -> [J*D, J*D] block-diagonal matrix."""
    J, D, _ = W.shape
    eye = jnp.eye(J, dtype=W.dtype)
    return jnp.einsum('jk,jde->jdke', eye, W).reshape(J * D, J * D)


def temporal_attention(x, W_query, W_key, W_value, W_output, num_heads,
                       *, tq=None, tk=None, matmul_dtype=jnp.bfloat16):
    """x: [B, S, J, D] -> [B, S, J, D] (same semantics as TemporalAttention.forward).

    matmul_dtype: dtype of MXU matmul inputs (bf16 recommended); accumulation and all
    softmax math stay in float32.
    """
    B, S, J, D = x.shape
    assert D % num_heads == 0, "token_dim must be divisible by num_heads"
    JD = J * D
    JH = J * num_heads
    Dh = D // num_heads

    def _pick_tile(t):
        if t is not None:
            return t
        if S <= 128:
            return S
        return 128 if S % 128 == 0 else S

    TQ = _pick_tile(tq)
    TK = _pick_tile(tk)
    assert S % TQ == 0 and S % TK == 0, "seq_len must be divisible by the tile sizes"
    assert TQ == S or TQ % 8 == 0
    assert TK == S or TK % 8 == 0

    # ---- one-time weight prep (in deployment: do once after parameter load) -----------
    scale = jnp.float32(D) ** -0.5                       # PyTorch scales by token_dim**-0.5
    w_q = _block_diag(W_query.astype(jnp.float32) * scale).astype(matmul_dtype)  # [JD, JD]
    w_kv = jnp.concatenate(
        [_block_diag(W_key), _block_diag(W_value)], axis=1).astype(matmul_dtype)  # [JD, 2JD]
    w_o = _block_diag(W_output).astype(matmul_dtype)                              # [JD, JD]

    x_flat = x.reshape(B, S, JD)                         # free reshape, no transpose

    kernel = functools.partial(
        temporal_attention_kernel, num_heads=num_heads, num_joints=J,
        token_dim=D, matmul_dtype=matmul_dtype)

    # Explicit VMEM budget (review item): double-buffered x/out blocks + resident
    # weights + per-tile score/prob temporaries + lane-padded softmax scratch.
    x_itemsize = jnp.dtype(x.dtype).itemsize
    w_itemsize = jnp.dtype(matmul_dtype).itemsize
    est = (2 * (TQ + TK + TQ) * JD * max(x_itemsize, 4)        # pipelined x_q / x_kv / out
           + 2 * 4 * JD * JD * w_itemsize                      # w_q + w_kv + w_o buffers
           + 8 * JH * TQ * max(TK, 128) * 4                    # s / p temporaries (f32)
           + 4 * JH * TQ * max(Dh, 128) * 4)                   # q / acc scratch (padded)
    vmem_limit = int(min(max(2 * est, 32 * 1024 * 1024), 64 * 1024 * 1024))

    out = pl.pallas_call(
        kernel,
        out_shape=jax.ShapeDtypeStruct((B, S, JD), x.dtype),
        grid_spec=pltpu.PrefetchScalarGridSpec(
            num_scalar_prefetch=0,
            grid=(B, S // TQ, S // TK),
            in_specs=[
                pl.BlockSpec((1, TQ, JD), lambda b, q, k: (b, q, 0)),   # x for the q tile
                pl.BlockSpec((1, TK, JD), lambda b, q, k: (b, k, 0)),   # x for the kv tile
                # Constant index maps -> weights DMA'd once, VMEM-resident across the grid.
                pl.BlockSpec((JD, JD), lambda b, q, k: (0, 0)),         # w_q (scaled)
                pl.BlockSpec((JD, 2 * JD), lambda b, q, k: (0, 0)),     # w_kv (fused K|V)
                pl.BlockSpec((JD, JD), lambda b, q, k: (0, 0)),         # w_o
            ],
            out_specs=pl.BlockSpec((1, TQ, JD), lambda b, q, k: (b, q, 0)),
            scratch_shapes=[
                pltpu.VMEM((JH, TQ, Dh), matmul_dtype),   # Q (head-split, per q tile)
                pltpu.VMEM((JH, TQ, 1), jnp.float32),     # running max
                pltpu.VMEM((JH, TQ, 1), jnp.float32),     # running sum
                pltpu.VMEM((JH, TQ, Dh), jnp.float32),    # output accumulator
            ]),
        compiler_params=pltpu.CompilerParams(
            dimension_semantics=("parallel", "parallel", "arbitrary"),
            vmem_limit_bytes=vmem_limit),
    )(x_flat, x_flat, w_q, w_kv, w_o)

    return out.reshape(B, S, J, D)


def temporal_attention_ref(x, Wq, Wk, Wv, Wo, num_heads):
    """Pure-JAX f32 reference reproducing the PyTorch forward exactly."""
    B, S, J, D = x.shape
    Dh = D // num_heads
    xt = jnp.transpose(x, (0, 2, 1, 3))  # [B, J, S, D]

    def proj(W):
        y = jnp.einsum('bjsd,jdk->bjsk', xt, W)
        y = y.reshape(B, J, S, num_heads, Dh)
        return jnp.transpose(y, (0, 1, 3, 2, 4))  # [B, J, H, S, Dh]

    Q, K, V = proj(Wq), proj(Wk), proj(Wv)
    mask = -jnp.triu(jnp.ones((S, S), jnp.float32), k=1) * 1e9
    attn = jnp.einsum('bjhsd,bjhtd->bjhst', Q, K) * (D ** -0.5) + mask
    attn = jax.nn.softmax(attn, axis=-1)
    o = jnp.einsum('bjhst,bjhtd->bjhsd', attn, V)
    o = jnp.transpose(o, (0, 1, 3, 2, 4)).reshape(B, J, S, D)
    o = jnp.einsum('bjsd,jdk->bjsk', o, Wo)
    return jnp.transpose(o, (0, 2, 1, 3))  # [B, S, J, D]


if __name__ == "__main__":
    # Shapes consistent with the module: x [batch, seq_len, num_joints, token_dim].
    B, S, J, D, H = 2, 8, 3, 32, 4

    key = jax.random.PRNGKey(0)
    kx, kq, kk, kvv, ko, kx2 = jax.random.split(key, 6)
    x = jax.random.normal(kx, (B, S, J, D), dtype=jnp.float32)

    # Deterministic xavier-uniform-style init for the [num_emb, D, D] weight tensors.
    fan_in, fan_out = D * D, J * D
    bound = (6.0 / (fan_in + fan_out)) ** 0.5
    W_query = jax.random.uniform(kq, (J, D, D), jnp.float32, -bound, bound)
    W_key = jax.random.uniform(kk, (J, D, D), jnp.float32, -bound, bound)
    W_value = jax.random.uniform(kvv, (J, D, D), jnp.float32, -bound, bound)
    W_output = jax.random.uniform(ko, (J, D, D), jnp.float32, -bound, bound)

    # --- single-tile case (TQ == TK == S): grid (B, 1, 1) ---
    out = temporal_attention(x, W_query, W_key, W_value, W_output, H)
    out = jax.block_until_ready(out)
    ref = temporal_attention_ref(x, W_query, W_key, W_value, W_output, H)
    assert out.shape == (B, S, J, D)
    # bf16 MXU inputs (f32 accumulation) + approx reciprocal loosen the tolerance.
    assert jnp.allclose(out, ref, atol=2e-2, rtol=2e-2), "mismatch vs reference (S=8)"

    # --- multi-tile case: exercises kv-tiled online softmax + causal tile skip ---
    S2 = 32
    x2 = jax.random.normal(kx2, (B, S2, J, D), dtype=jnp.float32)
    out2 = temporal_attention(x2, W_query, W_key, W_value, W_output, H, tq=8, tk=8)
    out2 = jax.block_until_ready(out2)
    ref2 = temporal_attention_ref(x2, W_query, W_key, W_value, W_output, H)
    assert out2.shape == (B, S2, J, D)
    assert jnp.allclose(out2, ref2, atol=2e-2, rtol=2e-2), "mismatch vs reference (tiled)"

    print("KERNEL_OK")
</pallas_src>

<mosaic_0001>
module attributes {stable_mosaic.version = 11 : i64} {
  func.func @temporal_attention_kernel(%arg0: i32, %arg1: i32, %arg2: i32, %arg3: memref<1x8x96xf32, #tpu.memory_space<vmem>>, %arg4: memref<1x8x96xf32, #tpu.memory_space<vmem>>, %arg5: memref<96x96xbf16, #tpu.memory_space<vmem>>, %arg6: memref<96x192xbf16, #tpu.memory_space<vmem>>, %arg7: memref<96x96xbf16, #tpu.memory_space<vmem>>, %arg8: memref<1x8x96xf32, #tpu.memory_space<vmem>>, %arg9: memref<12x8x8xbf16, #tpu.memory_space<vmem>>, %arg10: memref<12x8x1xf32, #tpu.memory_space<vmem>>, %arg11: memref<12x8x1xf32, #tpu.memory_space<vmem>>, %arg12: memref<12x8x8xf32, #tpu.memory_space<vmem>>) attributes {dimension_semantics = [#tpu.dimension_semantics<parallel>, #tpu.dimension_semantics<parallel>, #tpu.dimension_semantics<arbitrary>], iteration_bounds = array<i64: 2, 1, 1>, scalar_prefetch = 0 : i64, scratch_operands = 4 : i64, tpu.core_type = #tpu.core_type<tc>, window_params = [{transform_indices = @transform_0, window_bounds = array<i64: 1, 8, 96>}, {transform_indices = @transform_1, window_bounds = array<i64: 1, 8, 96>}, {pipeline_mode = #tpu.pipeline_mode<synchronous>, transform_indices = @transform_2, window_bounds = array<i64: 96, 96>}, {pipeline_mode = #tpu.pipeline_mode<synchronous>, transform_indices = @transform_3, window_bounds = array<i64: 96, 192>}, {pipeline_mode = #tpu.pipeline_mode<synchronous>, transform_indices = @transform_4, window_bounds = array<i64: 96, 96>}, {transform_indices = @transform_5, window_bounds = array<i64: 1, 8, 96>}]} {
    %c0_i32 = arith.constant 0 : i32
    %0 = arith.cmpi eq, %arg2, %c0_i32 : i32
    %1 = arith.extui %0 : i1 to i32
    %c0_i32_0 = arith.constant 0 : i32
    %2 = arith.cmpi ne, %1, %c0_i32_0 : i32
    scf.if %2 {
      %c0 = arith.constant 0 : index
      %c0_5 = arith.constant 0 : index
      %c0_6 = arith.constant 0 : index
      %12 = vector.load %arg3[%c0, %c0_5, %c0_6] : memref<1x8x96xf32, #tpu.memory_space<vmem>>, vector<1x8x96xf32>
      %13 = vector.shape_cast %12 : vector<1x8x96xf32> to vector<8x96xf32>
      %14 = arith.truncf %13 : vector<8x96xf32> to vector<8x96xbf16>
      %c0_7 = arith.constant 0 : index
      %c0_8 = arith.constant 0 : index
      %15 = vector.load %arg5[%c0_7, %c0_8] : memref<96x96xbf16, #tpu.memory_space<vmem>>, vector<96x96xbf16>
      %cst = arith.constant dense<0.000000e+00> : vector<8x96xf32>
      %16 = tpu.matmul %14, %15, %cst {dimension_numbers = #tpu.dot_dimension_numbers<[1], [0], [0], [1], [0, 0, 1, 1], [], []>} : vector<8x96xbf16>, vector<96x96xbf16>, vector<8x96xf32> -> vector<8x96xf32>
      %17 = vector.shape_cast %16 : vector<8x96xf32> to vector<8x12x8xf32>
      %18 = tpu.transpose %17, [1, 0, 2] : vector<8x12x8xf32> -> vector<12x8x8xf32>
      %19 = arith.truncf %18 : vector<12x8x8xf32> to vector<12x8x8xbf16>
      %c0_9 = arith.constant 0 : index
      %c0_10 = arith.constant 0 : index
      %c0_11 = arith.constant 0 : index
      %20 = vector.load %arg9[%c0_9, %c0_10, %c0_11] : memref<12x8x8xbf16, #tpu.memory_space<vmem>>, vector<12x8x8xbf16>
      tpu.vector_store %arg9[%c0_9, %c0_10, %c0_11], %19 {strides = array<i32>} : memref<12x8x8xbf16, #tpu.memory_space<vmem>>, vector<12x8x8xbf16>,
      %cst_12 = arith.constant -1.000000e+30 : f32
      %21 = vector.broadcast %cst_12 : f32 to vector<12x8x1xf32>
      %c0_13 = arith.constant 0 : index
      %c0_14 = arith.constant 0 : index
      %c0_15 = arith.constant 0 : index
      %22 = vector.load %arg10[%c0_13, %c0_14, %c0_15] : memref<12x8x1xf32, #tpu.memory_space<vmem>>, vector<12x8x1xf32>
      tpu.vector_store %arg10[%c0_13, %c0_14, %c0_15], %21 {strides = array<i32>} : memref<12x8x1xf32, #tpu.memory_space<vmem>>, vector<12x8x1xf32>,
      %cst_16 = arith.constant 0.000000e+00 : f32
      %23 = vector.broadcast %cst_16 : f32 to vector<12x8x1xf32>
      %c0_17 = arith.constant 0 : index
      %c0_18 = arith.constant 0 : index
      %c0_19 = arith.constant 0 : index
      %24 = vector.load %arg11[%c0_17, %c0_18, %c0_19] : memref<12x8x1xf32, #tpu.memory_space<vmem>>, vector<12x8x1xf32>
      tpu.vector_store %arg11[%c0_17, %c0_18, %c0_19], %23 {strides = array<i32>} : memref<12x8x1xf32, #tpu.memory_space<vmem>>, vector<12x8x1xf32>,
      %cst_20 = arith.constant 0.000000e+00 : f32
      %25 = vector.broadcast %cst_20 : f32 to vector<12x8x8xf32>
      %c0_21 = arith.constant 0 : index
      %c0_22 = arith.constant 0 : index
      %c0_23 = arith.constant 0 : index
      %26 = vector.load %arg12[%c0_21, %c0_22, %c0_23] : memref<12x8x8xf32, #tpu.memory_space<vmem>>, vector<12x8x8xf32>
      tpu.vector_store %arg12[%c0_21, %c0_22, %c0_23], %25 {strides = array<i32>} : memref<12x8x8xf32, #tpu.memory_space<vmem>>, vector<12x8x8xf32>,
    } else {
    }
    %c8_i32 = arith.constant 8 : i32
    %3 = arith.muli %arg2, %c8_i32 : i32
    %c8_i32_1 = arith.constant 8 : i32
    %4 = arith.muli %arg1, %c8_i32_1 : i32
    %c7_i32 = arith.constant 7 : i32
    %5 = arith.addi %4, %c7_i32 : i32
    %6 = arith.cmpi sle, %3, %5 : i32
    %7 = arith.extui %6 : i1 to i32
    %c0_i32_2 = arith.constant 0 : i32
    %8 = arith.cmpi ne, %7, %c0_i32_2 : i32
    scf.if %8 {
      %c0 = arith.constant 0 : index
      %c0_5 = arith.constant 0 : index
      %c0_6 = arith.constant 0 : index
      %12 = vector.load %arg4[%c0, %c0_5, %c0_6] : memref<1x8x96xf32, #tpu.memory_space<vmem>>, vector<1x8x96xf32>
      %13 = vector.shape_cast %12 : vector<1x8x96xf32> to vector<8x96xf32>
      %14 = arith.truncf %13 : vector<8x96xf32> to vector<8x96xbf16>
      %c0_7 = arith.constant 0 : index
      %c0_8 = arith.constant 0 : index
      %15 = vector.load %arg6[%c0_7, %c0_8] : memref<96x192xbf16, #tpu.memory_space<vmem>>, vector<96x192xbf16>
      %cst = arith.constant dense<0.000000e+00> : vector<8x192xf32>
      %16 = tpu.matmul %14, %15, %cst {dimension_numbers = #tpu.dot_dimension_numbers<[1], [0], [0], [1], [0, 0, 1, 1], [], []>} : vector<8x96xbf16>, vector<96x192xbf16>, vector<8x192xf32> -> vector<8x192xf32>
      %17 = vector.extract_strided_slice %16 {offsets = [0, 0], sizes = [8, 96], strides = [1, 1]} : vector<8x192xf32> to vector<8x96xf32>
      %18 = vector.shape_cast %17 : vector<8x96xf32> to vector<8x12x8xf32>
      %19 = tpu.transpose %18, [1, 0, 2] : vector<8x12x8xf32> -> vector<12x8x8xf32>
      %20 = arith.truncf %19 : vector<12x8x8xf32> to vector<12x8x8xbf16>
      %21 = vector.extract_strided_slice %16 {offsets = [0, 96], sizes = [8, 96], strides = [1, 1]} : vector<8x192xf32> to vector<8x96xf32>
      %22 = vector.shape_cast %21 : vector<8x96xf32> to vector<8x12x8xf32>
      %23 = tpu.transpose %22, [1, 0, 2] : vector<8x12x8xf32> -> vector<12x8x8xf32>
      %24 = arith.truncf %23 : vector<12x8x8xf32> to vector<12x8x8xbf16>
      %c0_9 = arith.constant 0 : index
      %c0_10 = arith.constant 0 : index
      %c0_11 = arith.constant 0 : index
      %25 = vector.load %arg9[%c0_9, %c0_10, %c0_11] : memref<12x8x8xbf16, #tpu.memory_space<vmem>>, vector<12x8x8xbf16>
      "tpu.trace_start"() <{level = 10 : i32, message = "bqd,bkd->bqk"}> : () -> ()
      %cst_12 = arith.constant dense<0.000000e+00> : vector<12x8x8xf32>
      %26 = tpu.matmul %25, %20, %cst_12 {dimension_numbers = #tpu.dot_dimension_numbers<[2], [2], [1], [1], [0, 0, 0, 1, 1, 1], [0], [0]>} : vector<12x8x8xbf16>, vector<12x8x8xbf16>, vector<12x8x8xf32> -> vector<12x8x8xf32>
      "tpu.trace_stop"() : () -> ()
      %c8_i32_13 = arith.constant 8 : i32
      %27 = arith.muli %arg1, %c8_i32_13 : i32
      %28 = tpu.iota {dimensions = array<i32: 0>} : vector<8x8xi32>
      %29 = vector.broadcast %27 : i32 to vector<8x8xi32>
      %30 = arith.addi %29, %28 : vector<8x8xi32>
      %c8_i32_14 = arith.constant 8 : i32
      %31 = arith.muli %arg2, %c8_i32_14 : i32
      %32 = tpu.iota {dimensions = array<i32: 1>} : vector<8x8xi32>
      %33 = vector.broadcast %31 : i32 to vector<8x8xi32>
      %34 = arith.addi %33, %32 : vector<8x8xi32>
      %35 = arith.cmpi sgt, %34, %30 : vector<8x8xi32>
      %cst_15 = arith.constant -1.000000e+09 : f32
      %cst_16 = arith.constant 0.000000e+00 : f32
      %36 = vector.broadcast %cst_15 : f32 to vector<8x8xf32>
      %37 = vector.broadcast %cst_16 : f32 to vector<8x8xf32>
      %38 = arith.select %35, %36, %37 : vector<8x8xi1>, vector<8x8xf32>
      %39 = vector.shape_cast %38 : vector<8x8xf32> to vector<1x8x8xf32>
      %40 = vector.broadcast %39 : vector<1x8x8xf32> to vector<12x8x8xf32>
      %41 = arith.addf %26, %40 : vector<12x8x8xf32>
      %c0_17 = arith.constant 0 : index
      %c0_18 = arith.constant 0 : index
      %c0_19 = arith.constant 0 : index
      %42 = vector.load %arg10[%c0_17, %c0_18, %c0_19] : memref<12x8x1xf32, #tpu.memory_space<vmem>>, vector<12x8x1xf32>
      %cst_20 = arith.constant dense<0xFF800000> : vector<12x8xf32>
      %43 = vector.multi_reduction <maximumf>, %41, %cst_20 [2] : vector<12x8x8xf32> to vector<12x8xf32>
      %44 = vector.shape_cast %43 : vector<12x8xf32> to vector<12x8x1xf32>
      %45 = arith.maximumf %42, %44 : vector<12x8x1xf32>
      %46 = arith.subf %42, %45 : vector<12x8x1xf32>
      %47 = math.exp %46 : vector<12x8x1xf32>
      %48 = vector.broadcast %45 : vector<12x8x1xf32> to vector<12x8x8xf32>
      %49 = arith.subf %41, %48 : vector<12x8x8xf32>
      %50 = math.exp %49 : vector<12x8x8xf32>
      %c0_21 = arith.constant 0 : index
      %c0_22 = arith.constant 0 : index
      %c0_23 = arith.constant 0 : index
      %51 = vector.load %arg11[%c0_21, %c0_22, %c0_23] : memref<12x8x1xf32, #tpu.memory_space<vmem>>, vector<12x8x1xf32>
      %52 = arith.mulf %47, %51 : vector<12x8x1xf32>
      %cst_24 = arith.constant dense<0.000000e+00> : vector<12x8xf32>
      %53 = vector.multi_reduction <add>, %50, %cst_24 [2] : vector<12x8x8xf32> to vector<12x8xf32>
      %54 = vector.shape_cast %53 : vector<12x8xf32> to vector<12x8x1xf32>
      %55 = arith.addf %52, %54 : vector<12x8x1xf32>
      %c0_25 = arith.constant 0 : index
      %c0_26 = arith.constant 0 : index
      %c0_27 = arith.constant 0 : index
      %56 = vector.load %arg11[%c0_25, %c0_26, %c0_27] : memref<12x8x1xf32, #tpu.memory_space<vmem>>, vector<12x8x1xf32>
      tpu.vector_store %arg11[%c0_25, %c0_26, %c0_27], %55 {strides = array<i32>} : memref<12x8x1xf32, #tpu.memory_space<vmem>>, vector<12x8x1xf32>,
      %c0_28 = arith.constant 0 : index
      %c0_29 = arith.constant 0 : index
      %c0_30 = arith.constant 0 : index
      %57 = vector.load %arg12[%c0_28, %c0_29, %c0_30] : memref<12x8x8xf32, #tpu.memory_space<vmem>>, vector<12x8x8xf32>
      %58 = vector.broadcast %47 : vector<12x8x1xf32> to vector<12x8x8xf32>
      %59 = arith.mulf %58, %57 : vector<12x8x8xf32>
      %60 = arith.truncf %50 : vector<12x8x8xf32> to vector<12x8x8xbf16>
      "tpu.trace_start"() <{level = 10 : i32, message = "bqk,bkd->bqd"}> : () -> ()
      %cst_31 = arith.constant dense<0.000000e+00> : vector<12x8x8xf32>
      %61 = tpu.matmul %60, %24, %cst_31 {dimension_numbers = #tpu.dot_dimension_numbers<[2], [1], [1], [2], [0, 0, 0, 1, 1, 2], [0], [0]>} : vector<12x8x8xbf16>, vector<12x8x8xbf16>, vector<12x8x8xf32> -> vector<12x8x8xf32>
      "tpu.trace_stop"() : () -> ()
      %62 = arith.addf %59, %61 : vector<12x8x8xf32>
      %c0_32 = arith.constant 0 : index
      %c0_33 = arith.constant 0 : index
      %c0_34 = arith.constant 0 : index
      %63 = vector.load %arg12[%c0_32, %c0_33, %c0_34] : memref<12x8x8xf32, #tpu.memory_space<vmem>>, vector<12x8x8xf32>
      tpu.vector_store %arg12[%c0_32, %c0_33, %c0_34], %62 {strides = array<i32>} : memref<12x8x8xf32, #tpu.memory_space<vmem>>, vector<12x8x8xf32>,
      %c0_35 = arith.constant 0 : index
      %c0_36 = arith.constant 0 : index
      %c0_37 = arith.constant 0 : index
      %64 = vector.load %arg10[%c0_35, %c0_36, %c0_37] : memref<12x8x1xf32, #tpu.memory_space<vmem>>, vector<12x8x1xf32>
      tpu.vector_store %arg10[%c0_35, %c0_36, %c0_37], %45 {strides = array<i32>} : memref<12x8x1xf32, #tpu.memory_space<vmem>>, vector<12x8x1xf32>,
    } else {
    }
    %c0_i32_3 = arith.constant 0 : i32
    %9 = arith.cmpi eq, %arg2, %c0_i32_3 : i32
    %10 = arith.extui %9 : i1 to i32
    %c0_i32_4 = arith.constant 0 : i32
    %11 = arith.cmpi ne, %10, %c0_i32_4 : i32
    scf.if %11 {
      %c0 = arith.constant 0 : index
      %c0_5 = arith.constant 0 : index
      %c0_6 = arith.constant 0 : index
      %12 = vector.load %arg12[%c0, %c0_5, %c0_6] : memref<12x8x8xf32, #tpu.memory_space<vmem>>, vector<12x8x8xf32>
      %c0_7 = arith.constant 0 : index
      %c0_8 = arith.constant 0 : index
      %c0_9 = arith.constant 0 : index
      %13 = vector.load %arg11[%c0_7, %c0_8, %c0_9] : memref<12x8x1xf32, #tpu.memory_space<vmem>>, vector<12x8x1xf32>
      %14 = tpu.reciprocal %13 {approx = true} : vector<12x8x1xf32> -> vector<12x8x1xf32>
      %15 = vector.broadcast %14 : vector<12x8x1xf32> to vector<12x8x8xf32>
      %16 = arith.mulf %12, %15 : vector<12x8x8xf32>
      %17 = tpu.transpose %16, [1, 0, 2] : vector<12x8x8xf32> -> vector<8x12x8xf32>
      %18 = vector.shape_cast %17 : vector<8x12x8xf32> to vector<8x96xf32>
      %19 = arith.truncf %18 : vector<8x96xf32> to vector<8x96xbf16>
      %c0_10 = arith.constant 0 : index
      %c0_11 = arith.constant 0 : index
      %20 = vector.load %arg7[%c0_10, %c0_11] : memref<96x96xbf16, #tpu.memory_space<vmem>>, vector<96x96xbf16>
      %cst = arith.constant dense<0.000000e+00> : vector<8x96xf32>
      %21 = tpu.matmul %19, %20, %cst {dimension_numbers = #tpu.dot_dimension_numbers<[1], [0], [0], [1], [0, 0, 1, 1], [], []>} : vector<8x96xbf16>, vector<96x96xbf16>, vector<8x96xf32> -> vector<8x96xf32>
      %c0_12 = arith.constant 0 : index
      %c0_13 = arith.constant 0 : index
      %c0_14 = arith.constant 0 : index
      %22 = vector.load %arg8[%c0_12, %c0_13, %c0_14] : memref<1x8x96xf32, #tpu.memory_space<vmem>>, vector<1x8x96xf32>
      %23 = vector.shape_cast %22 : vector<1x8x96xf32> to vector<8x96xf32>
      %24 = vector.shape_cast %21 : vector<8x96xf32> to vector<1x8x96xf32>
      tpu.vector_store %arg8[%c0_12, %c0_13, %c0_14], %24 {strides = array<i32>} : memref<1x8x96xf32, #tpu.memory_space<vmem>>, vector<1x8x96xf32>,
    } else {
    }
    return
  }
  func.func @transform_0(%arg0: i32, %arg1: i32, %arg2: i32) -> (i32, i32, i32) {
    %c0_i32 = arith.constant 0 : i32
    %c0_i32_0 = arith.constant 0 : i32
    return %arg0, %arg1, %c0_i32 : i32, i32, i32
  }
  func.func @transform_1(%arg0: i32, %arg1: i32, %arg2: i32) -> (i32, i32, i32) {
    %c0_i32 = arith.constant 0 : i32
    %c0_i32_0 = arith.constant 0 : i32
    return %arg0, %arg2, %c0_i32 : i32, i32, i32
  }
  func.func @transform_2(%arg0: i32, %arg1: i32, %arg2: i32) -> (i32, i32) {
    %c0_i32 = arith.constant 0 : i32
    %c0_i32_0 = arith.constant 0 : i32
    %c0_i32_1 = arith.constant 0 : i32
    return %c0_i32, %c0_i32_0 : i32, i32
  }
  func.func @transform_3(%arg0: i32, %arg1: i32, %arg2: i32) -> (i32, i32) {
    %c0_i32 = arith.constant 0 : i32
    %c0_i32_0 = arith.constant 0 : i32
    %c0_i32_1 = arith.constant 0 : i32
    return %c0_i32, %c0_i32_0 : i32, i32
  }
  func.func @transform_4(%arg0: i32, %arg1: i32, %arg2: i32) -> (i32, i32) {
    %c0_i32 = arith.constant 0 : i32
    %c0_i32_0 = arith.constant 0 : i32
    %c0_i32_1 = arith.constant 0 : i32
    return %c0_i32, %c0_i32_0 : i32, i32
  }
  func.func @transform_5(%arg0: i32, %arg1: i32, %arg2: i32) -> (i32, i32, i32) {
    %c0_i32 = arith.constant 0 : i32
    %c0_i32_0 = arith.constant 0 : i32
    return %arg0, %arg1, %c0_i32 : i32, i32, i32
  }
}

</mosaic_0001>

<bundles_post_ra>
// kernel: tpu_custom_call.1
= control target key start
LH: loop header
LB: loop body
LE: loop exit
PB: predicated region body
PF: predicated region fallthrough
CT: control target
= control target key end

     0   :  { %s6393_s0 = inlined_call_operand.hbm [shape: f32[2,8,96], index: 0, kind: input, shape index: {}]   ;;  %s6394_s1 = inlined_call_operand.hbm [shape: f32[2,8,96], index: 1, kind: input, shape index: {}]   ;;  %s6395_s2 = inlined_call_operand.hbm [shape: bf16[96,96], index: 2, kind: input, shape index: {}]   ;;  %s6396_s3 = inlined_call_operand.hbm [shape: bf16[96,192], index: 3, kind: input, shape index: {}]   ;;  %s6397_s4 = inlined_call_operand.hbm [shape: bf16[96,96], index: 4, kind: input, shape index: {}]   ;;  %s6398_s5 = inlined_call_operand.hbm [shape: f32[2,8,96], index: 5, kind: output, shape index: {}]  }
   0x1   :  { %6400 = sst [smem:[#allocation21_spill]] %s6395_s2 }
   0x2   :  { %6401 = sst [smem:[#allocation22_spill]] %s6396_s3 }
   0x3   :  { %6402 = sst [smem:[#allocation23_spill]] %s6397_s4 }
   0x4   :  { %10 = vsyncpa [#allocation7], 0 }
   0x5   :  { %12 = vsyncpa [#allocation7 + $0x1], 0 }
   0x6   :  { %13 = vsyncpa [#allocation10], 0 }
   0x7   :  { %15 = vsyncpa [#allocation10 + $0x1], 0 }
   0x8   :  { %16 = vsyncpa [#allocation13], 0 }
   0x9   :  { %17 = vsyncpa [#allocation8], 0 }
   0xa   :  { %19 = vsyncpa [#allocation8 + $0x1], 0  ;;  %s5237_s18 = smov 0   ;;  %s5239_s19 = smov 0  }
   0xb   :  { %s5241_s20 = smov 0   ;;  %s5243_s21 = smov 0  }
   0xc   :  { %s5245_s22 = smov 0   ;;  %s5247_s23 = smov 0  }
   0xd LB: > { %s5268_s24 = sadd.s32 4294967295, %s5174_s23   ;;  %s4371_s25 = sadd.s32 4294967294, %s5174_s23   ;;  %s5174_s23 = sphi %s5247_s23, %s25_s23   ;;  %s5170_s22 = sphi %s5245_s22, %s6428_s22   ;;  %s5166_s21 = sphi %s5243_s21, %s6427_s21   ;;  %s5162_s20 = sphi %s5241_s20, %s6426_s20   ;;  %s5158_s19 = sphi %s5239_s19, %s6425_s19   ;;  %s5154_s18 = sphi %s5237_s18, %s6424_s18  }
   0xe   : > { %p66_p0 = scmp.ne.s32.totalorder %s5158_s19, %s5154_s18  ;;  %p6399_p1 = scmp.eq.s32.totalorder %s5268_s24, 0 }
   0xf   : > { %p183_p2 = scmp.eq.s32.totalorder %s5268_s24, 1  ;;  %p189_p3 = scmp.eq.s32.totalorder %s4371_s25, 1 }
  0x10   : > { %p5277_p4 = por %p6399_p1, %p66_p0  ;;  %p4372_p5 = scmp.ge.s32.totalorder %s5174_s23, 1 }
  0x11   : > { %p5282_p6 = por %p189_p3, %p66_p0  ;;  %p196_p7 = scmp.lt.s32.totalorder %s5174_s23, 3 }
  0x12   : > { %s5176_s29 = smov [#allocation11]   ;;  %s5177_s7 = smov [#allocation12]  }
  0x13   : > { %p5287_p8 = pnand %p4372_p5, %p196_p7  ;;  %s208_s30 = sshll.u32 %s5176_s29, 4  ;;  %s209_s30 = int_to_ptr.vmem [resolvable:$true] %s208_s30 }
  0x14   : > { %s221_s8 = sshll.u32 %s5177_s7, 4  ;;  %s4959_s9 = scalar_lea.vmem %s209_s30, 768  ;;  %s222_s8 = int_to_ptr.vmem [resolvable:$true] %s221_s8 }
  0x15   : > { %p4739_p9 = pneg %p5287_p8  ;;  %p4960_p13 = scmp.ne.s32.totalorder %s209_s30, %s4959_s9 }
  0x16   : > { %p4967_p5 = scmp.lt.s32.totalorder %s209_s30, %s209_s30  ;;  %p4968_p7 = scmp.lt.s32.totalorder %s4959_s9, %s4959_s9 }
  0x17   : > { %p5296_p11 = pnand %p4739_p9, %p6399_p1 }
  0x18   : > { %p4969_p10 = por %p4968_p7, %p4967_p5 }
  0x19   : > { %p4950_p12 = pneg %p5296_p11 }
  0x1b   : > { %p4962_p0 = pnand %p4960_p13, %p4950_p12 }
  0x1d   : > { %p4963_p3 = pneg %p4962_p0 }
  0x1f   : > { %p4970_p9 = pnand %p4969_p10, %p4963_p3 }
  0x21   : > { %4973 = shalt.err (!%p4970_p9)
}
  0x22   : > { %s5178_s10 = smov 64   ;;  %s5179_s11 = smov 4  }
  0x23   : > { %s6407_s2 = sld [smem:[#allocation21_spill]]  ;;  %s4985_s14 = scalar_lea.vmem %s222_s8, 1536 }
  0x24   : > { %p4986_p13 = scmp.ne.s32.totalorder %s222_s8, %s4985_s14  ;;  %p4993_p10 = scmp.lt.s32.totalorder %s222_s8, %s222_s8 }
  0x25   : > { %p4994_p3 = scmp.lt.s32.totalorder %s4985_s14, %s4985_s14 }
  0x26   : > { %p4988_p0 = pnand %p4986_p13, %p4950_p12 }
  0x27   : > { %p4995_p7 = por %p4994_p3, %p4993_p10 }
  0x28   : > { %p4989_p5 = pneg %p4988_p0 }
  0x29   : > { %4742 = dma.hbm_to_vmem [thread:$0]  (!%p5296_p11), %s6407_s2, 768, %s209_s30, [#allocation10], %s5178_s10, %s5178_s10, %s5179_s11  }
  0x2a   : > { %p4996_p9 = pnand %p4995_p7, %p4989_p5 }
  0x2c   : > { %4999 = shalt.err (!%p4996_p9)
}
  0x2d   : > { %s5180_s15 = smov 128   ;;  %s5181_s16 = smov 8  }
  0x2e   : > { %s6408_s3 = sld [smem:[#allocation22_spill]]  ;;  %s5182_s29 = smov [#allocation14]  }
  0x2f   : > { %s234_s30 = sshll.u32 %s5182_s29, 4  ;;  %s235_s30 = int_to_ptr.vmem [resolvable:$true] %s234_s30 }
  0x30   : > { %s5011_s7 = scalar_lea.vmem %s235_s30, 768  ;;  %p5019_p5 = scmp.lt.s32.totalorder %s235_s30, %s235_s30 }
  0x31   : > { %p5012_p13 = scmp.ne.s32.totalorder %s235_s30, %s5011_s7  ;;  %p5020_p3 = scmp.lt.s32.totalorder %s5011_s7, %s5011_s7 }
  0x33   : > { %p5014_p0 = pnand %p5012_p13, %p4950_p12  ;;  %p5021_p7 = por %p5020_p3, %p5019_p5 }
  0x34   : > { %4745 = dma.hbm_to_vmem [thread:$0]  (!%p5296_p11), %s6408_s3, 1536, %s222_s8, [#allocation13], %s5180_s15, %s5180_s15, %s5181_s16  }
  0x35   : > { %p5015_p10 = pneg %p5014_p0 }
  0x37   : > { %p5022_p9 = pnand %p5021_p7, %p5015_p10 }
  0x39   : > { %5025 = shalt.err (!%p5022_p9)
}
  0x3a   : > { %s6409_s4 = sld [smem:[#allocation23_spill]]  ;;  %s44_s12 = sadd.s32 1, %s5170_s22 }
  0x3b   : > { %p46_p12 = scmp.ge.s32.totalorder %s44_s12, 2  ;;  %s53_s6 = sadd.s32 1, %s5162_s20 }
  0x3c   : > { %p60_p13 = scmp.ne.s32.totalorder %s5162_s20, %s5158_s19  ;;  %p61_p0 = scmp.eq.s32.totalorder %s5174_s23, 0 }
  0x3d   : > { %s6430_s12 = smov (%p46_p12, %s44_s12), 0  ;;  %s4378_s17 = sshll.u32 %s5170_s22, 7 }
  0x3e   : > { %p5339_p10 = por %p61_p0, %p60_p13  ;;  %p5345_p5 = por %p183_p2, %p60_p13 }
  0x3f   : > { %s5183_s13 = smov [#allocation6]  }
  0x40   : > { %4748 = dma.hbm_to_vmem [thread:$0]  (!%p5296_p11), %s6409_s4, 768, %s235_s30, [#allocation13], %s5178_s10, %s5178_s10, %s5179_s11  }
  0x41   : > { %s48_s10 = ssub.s32 %s5170_s22, %s6430_s12  ;;  %p4763_p11 = scmp.lt.s32.totalorder %s5174_s23, 2 }
  0x42   : > { %p51_p3 = scmp.eq.s32.totalorder %s48_s10, 0  ;;  %s248_s11 = sand.u32 1, %s5162_s20  }
  0x43   : > { %s4377_s15 = sshll.u32 %s248_s11, 3  ;;  %s258_s30 = scalar_lea.hbm %s6393_s0, %s4378_s17 }
  0x44   : > { %s5354_s16 = scalar_select %p51_p3, %s5162_s20, %s53_s6  }
  0x45   : > { %s252_s7 = scalar_lea.vmem [#allocation6], %s4377_s15  ;;  %p5362_p2 = pnand %p4763_p11, %p5339_p10 }
  0x46   : > { %s260_s8 = sshll.u32 %s252_s7, 4  ;;  %s5369_s6 = scalar_lea.hbm %s6394_s1, %s4378_s17  ;;  %s261_s8 = int_to_ptr.vmem [resolvable:$true] %s260_s8 }
  0x47   : > { %s267_s10 = sand.u32 1, %s5174_s23   ;;  %s249_s4 = scalar_lea.sflag [#allocation7], %s248_s11 }
  0x48   : > { %p5028_p7 = pneg %p5362_p2  ;;  %s5039_s25 = scalar_lea.vmem %s261_s8, 128 }
  0x49   : > { %p5040_p9 = scmp.ne.s32.totalorder %s261_s8, %s5039_s25  ;;  %s5044_s29 = sshll.u32 %s5183_s13, 4  ;;  %s5045_s29 = int_to_ptr.vmem [resolvable:$false] %s5044_s29 }
  0x4a   : > { %s5046_s7 = scalar_lea.vmem %s5045_s29, 256  ;;  %p5047_p0 = scmp.lt.s32.totalorder %s261_s8, %s5045_s29 }
  0x4b   : > { %p5042_p12 = pnand %p5040_p9, %p5028_p7  ;;  %p5048_p10 = scmp.lt.s32.totalorder %s5046_s7, %s5039_s25 }
  0x4d   : > { %p5043_p13 = pneg %p5042_p12  ;;  %p5049_p11 = por %p5048_p10, %p5047_p0 }
  0x4f   : > { %p5050_p3 = pnand %p5049_p11, %p5043_p13 }
  0x51   : > { %5053 = shalt.err (!%p5050_p3)
}
  0x52   : > { %4752 = dma.hbm_to_vmem [thread:$0]  (!%p5362_p2), %s258_s30, 128, %s261_s8, %s249_s4  }
  0x53   : > { %s271_s2 = scalar_lea.vmem [#allocation9], %s4377_s15  ;;  %s268_s11 = scalar_lea.sflag [#allocation10], %s267_s10 }
  0x54   : > { %s279_s3 = sshll.u32 %s271_s2, 4  ;;  %s5184_s13 = smov [#allocation9]   ;;  %s280_s3 = int_to_ptr.vmem [resolvable:$true] %s279_s3 }
  0x55   : > { %s5067_s17 = scalar_lea.vmem %s280_s3, 128  ;;  %s5072_s29 = sshll.u32 %s5184_s13, 4  ;;  %s5073_s29 = int_to_ptr.vmem [resolvable:$false] %s5072_s29 }
  0x56   : > { %p5068_p9 = scmp.ne.s32.totalorder %s280_s3, %s5067_s17  ;;  %s5074_s25 = scalar_lea.vmem %s5073_s29, 256 }
  0x57   : > { %p5075_p13 = scmp.lt.s32.totalorder %s280_s3, %s5073_s29  ;;  %p5076_p0 = scmp.lt.s32.totalorder %s5074_s25, %s5067_s17 }
  0x58   : > { %p5070_p12 = pnand %p5068_p9, %p5028_p7 }
  0x59   : > { %p5077_p10 = por %p5076_p0, %p5075_p13 }
  0x5a   : > { %p5071_p1 = pneg %p5070_p12 }
  0x5c   : > { %p5078_p11 = pnand %p5077_p10, %p5071_p1 }
  0x5e   : > { %5081 = shalt.err (!%p5078_p11)
}
  0x5f   : > { %4755 = dma.hbm_to_vmem [thread:$0]  (!%p5362_p2), %s5369_s6, 128, %s280_s3, %s268_s11  }
  0x60   : > { %288 = sbr.rel (%p5287_p8) target bundleno = 1715 (0x6b3), region = 40  ;;  %s5388_s4 = sand.u32 (!%p5287_p8), 1, %s5158_s19  }
  0x61   : > { %s5391_s15 = sshll.u32 (!%p5287_p8), %s5388_s4, 3  ;;  %s291_s30 = scalar_lea.sflag (!%p5287_p8), [#allocation7], %s5388_s4 }
  0x62   : > { %s294_s8 = scalar_lea.vmem (!%p5287_p8), [#allocation6], %s5391_s15 }
  0x65   : > { %5133 = dma.done.wait (%p5277_p4), %s291_s30, 128  }
  0x66   : > { %5135 = vsyncadd (%p5277_p4), %s291_s30, 4294967168  ;;  %s299_s28 = sand.u32 1, %s5268_s24   ;;  %s303_s6 = scalar_lea.vmem [#allocation9], %s5391_s15 }
  0x67   : > { %s300_s9 = scalar_lea.sflag [#allocation10], %s299_s28 }
  0x68   : > { %5137 = dma.done.wait (%p5277_p4), %s300_s9, 128  }
  0x69   : > { %5139 = vsyncadd (%p5277_p4), %s300_s9, 4294967168  ;;  %p6413_p1 = scmp.eq.s32.totalorder %s5268_s24, 0 }
  0x6b   : > { %5141 = dma.done.wait (%p6413_p1), [#allocation10], 768   ;;  %p6414_p8 = pmov %p6413_p1 }
  0x6c   : > { %p6415_p2 = pmov %p6413_p1 }
  0x6d   : > { %5143 = vsyncadd (%p6414_p8), [#allocation10], 4294966528 }
  0x6e   : > { %5145 = dma.done.wait (%p6415_p2), [#allocation13], 2304   ;;  %p6416_p7 = pmov %p6413_p1 }
  0x6f   : > { %v5185_v0 = vmov 0.0   ;;  %vm5186_vm0 = vmmov 0   ;;  %v5187_v1 = vmov 0   ;;  %v4846_v2 = vld [vmem:[#allocation11 + $0x28] sm:$0xff]   ;;  %v4850_v5 = vld [vmem:[#allocation11 + $0x20] sm:$0xff]   ;;  %v4854_v8 = vld [vmem:[#allocation11 + $0x18] sm:$0xff]   ;;  %v485_v34 = vlaneseq }
  0x70   : > { %5147 = vsyncadd (%p6416_p7), [#allocation13], 4294964992  ;;  %4545 = vmatprep.subr.bf16.mxu0 %v5185_v0  ;;  %4557 = vmatprep.mubr.msk.bf16.mxu0 %vm5186_vm0, %v5185_v0  ;;  %v4847_v3 = vld [vmem:[#allocation12 + $0x54] ss:$8 sps:$4 sm:$0xff]   ;;  %v4849_v4 = vld [vmem:[#allocation12 + $0x50] ss:$8 sps:$4 sm:$0xff]  }
  0x71   : > { %1068 = vmatprep.mubr.bf16.mxu1 %v5187_v1  ;;  %4844 = vset.pattern.permute.xlu0 %v5187_v1  ;;  %v4851_v6 = vld [vmem:[#allocation12 + $0x44] ss:$8 sps:$4 sm:$0xff]   ;;  %v4853_v7 = vld [vmem:[#allocation12 + $0x40] ss:$8 sps:$4 sm:$0xff]   ;;  %v4855_v9 = vld [vmem:[#allocation12 + $0x34] ss:$8 sps:$4 sm:$0xff]  }
  0x72   : > { %4845 = vset.pattern.permute.xlu1 %v5187_v1  ;;  %4546 = vmatpush3.bf16.msra.mxu0 %v4846_v2  ;;  %v4857_v10 = vld [vmem:[#allocation12 + $0x30] ss:$8 sps:$4 sm:$0xff]   ;;  %v4859_v11 = vld [vmem:[#allocation12 + $0x24] ss:$8 sps:$4 sm:$0xff]   ;;  %v4861_v13 = vld [vmem:[#allocation12 + $0x20] ss:$8 sps:$4 sm:$0xff]  }
  0x73   : > { %1040 = vmatprep.subr.bf16.mxu1 %v4847_v3  ;;  %4547 = vmatprep.subr.bf16.mxu0 %v5185_v0  ;;  %v4858_v12 = vld [vmem:[#allocation11 + $0x10] sm:$0xff]   ;;  %v4863_v14 = vld [vmem:[#allocation12 + $0x14] ss:$8 sps:$4 sm:$0xff]   ;;  %v4865_v16 = vld [vmem:[#allocation12 + $0x10] ss:$8 sps:$4 sm:$0xff]   ;;  %vm402_vm1 = vcmask 785408  }
  0x74   : > { %1041 = vmatpush1.bf16.msra.mxu1 %v4849_v4  ;;  %v4862_v15 = vld [vmem:[#allocation11 + $0x8] sm:$0xff]   ;;  %v4867_v17 = vld [vmem:[#allocation12 + $0x4] ss:$8 sps:$4 sm:$0xff]   ;;  %v4866_v18 = vld [vmem:[#allocation11] sm:$0xff]   ;;  %s5188_s24 = smov 104   ;;  %s5189_s26 = smov 120  }
  0x75   : > { %1042 = vmatprep.subr.bf16.mxu1 %v4851_v6  ;;  %v352_v19 = vld [vmem:[%s294_s8] sm:$0xff]  ;;  %v4869_v20 = vld [vmem:[#allocation12] ss:$8 sps:$4 sm:$0xff]   ;;  %s5190_s10 = smov 112   ;;  %s5191_s7 = smov 88   ;;  %vm938_vm2 = vcmask 64512  }
  0x76   : > { %4548 = vmatpush3.bf16.msra.mxu0 %v4850_v5  ;;  %v958_v21 = vld [vmem:[%s303_s6] sm:$0xff]  ;;  %v353_v22 = vpack.c.bf16 %v352_v19, %v352_v19  ;;  %s5192_s2 = smov 96   ;;  %s5193_s3 = smov 72   ;;  %939 = vst.msk [vmem:[#allocation5] sm:$0xff] %vm938_vm2, %v5185_v0  ;;  %940 = vst.msk [vmem:[#allocation5 + $0x8] sm:$0xff] %vm938_vm2, %v5185_v0  ;;  %v5516_v38 = vshrl.u32 %v485_v34, 7 }
  0x77   : > { %4549 = vmatprep.subr.bf16.mxu0 %v5185_v0  ;;  %v959_v23 = vpack.c.bf16 %v958_v21, %v958_v21  ;;  %s5194_s11 = smov 80   ;;  %941 = vst.msk [vmem:[#allocation5 + $0x10] sm:$0xff] %vm938_vm2, %v5185_v0  ;;  %942 = vst.msk [vmem:[#allocation5 + $0x18] sm:$0xff] %vm938_vm2, %v5185_v0  ;;  %s5195_s17 = smov 56   ;;  %v5199_v32 = vmov 1983009808  }
  0x78   : > { %1043 = vmatpush1.bf16.msra.mxu1 %v4853_v7  ;;  %943 = vst.msk [vmem:[#allocation5 + $0x20] sm:$0xff] %vm938_vm2, %v5185_v0  ;;  %944 = vst.msk [vmem:[#allocation5 + $0x28] sm:$0xff] %vm938_vm2, %v5185_v0  ;;  %s5196_s13 = smov 64   ;;  %s5197_s29 = smov 40   ;;  %v483_v33 = vunpack.c.l.s4 %v5199_v32  ;;  %v5200_v35 = vmov 1934713408  }
  0x79   : > { %1044 = vmatprep.subr.bf16.mxu1 %v4855_v9  ;;  %945 = vst.msk [vmem:[#allocation5 + $0x30] sm:$0xff] %vm938_vm2, %v5185_v0  ;;  %946 = vst.msk [vmem:[#allocation5 + $0x38] sm:$0xff] %vm938_vm2, %v5185_v0  ;;  %s5198_s25 = smov 48   ;;  %v547_v36 = vunpack.c.l.s4 %v5200_v35  ;;  %vm900_vm3 = vcmask 60416   ;;  %vm913_vm4 = vcmask 7168   ;;  %s5202_s30 = smov 32  }
  0x7a   : > { %4550 = vmatpush3.bf16.msra.mxu0 %v4854_v8  ;;  %947 = vst.msk [vmem:[#allocation5 + $0x40] sm:$0xff] %vm938_vm2, %v5185_v0  ;;  %948 = vst.msk [vmem:[#allocation5 + $0x48] sm:$0xff] %vm938_vm2, %v5185_v0  ;;  %v484_v37 = vunpack.c.0.s8 %v483_v33  ;;  %vm2955_vm6 = vcmask 1043456   ;;  %s5203_s8 = smov 16   ;;  %s5204_s28 = smov 8   ;;  %vm4106_vm7 = vcmask 130048  }
  0x7b   : > { %4551 = vmatprep.subr.bf16.mxu0 %v5185_v0  ;;  %949 = vst.msk [vmem:[#allocation5 + $0x50] sm:$0xff] %vm938_vm2, %v5185_v0  ;;  %950 = vst.msk [vmem:[#allocation5 + $0x58] sm:$0xff] %vm938_vm2, %v5185_v0  ;;  %v548_v41 = vunpack.c.0.s8 %v547_v36  ;;  %s5205_s9 = smov 24   ;;  %vm4108_vm8 = vcmask 195584   ;;  %vm4110_vm9 = vcmask 261120   ;;  %vm4112_vm10 = vcmask 326656  }
  0x7c   : > { %1045 = vmatpush1.bf16.msra.mxu1 %v4857_v10  ;;  %v5519_v42 = vsub.s32 %v484_v37, %v5516_v38  ;;  %926 = vst.msk [vmem:[#allocation4] sm:$0xff] %vm913_vm4, %v5185_v0  ;;  %927 = vst.msk [vmem:[#allocation4 + $0x8] sm:$0xff] %vm913_vm4, %v5185_v0  ;;  %vm4114_vm11 = vcmask 392192   ;;  %vm4116_vm12 = vcmask 457728   ;;  %vm4118_vm13 = vcmask 523264   ;;  %s4480_s6 = sshll.u32 %s5166_s21, 7 }
  0x7d   : > { %1046 = vmatprep.subr.bf16.mxu1 %v4859_v11  ;;  %v5526_v49 = vsub.s32 %v548_v41, %v5516_v38  ;;  %928 = vst.msk [vmem:[#allocation4 + $0x10] sm:$0xff] %vm913_vm4, %v5185_v0  ;;  %929 = vst.msk [vmem:[#allocation4 + $0x18] sm:$0xff] %vm913_vm4, %v5185_v0  ;;  %vm4120_vm14 = vcmask 588800   ;;  %vm4122_vm15 = vcmask 654336   ;;  %s5206_s21 = smov [#allocation15]  }
  0x7e   : > { %4552 = vmatpush3.bf16.msra.mxu0 %v4858_v12  ;;  %930 = vst.msk [vmem:[#allocation4 + $0x20] sm:$0xff] %vm913_vm4, %v5185_v0  ;;  %931 = vst.msk [vmem:[#allocation4 + $0x28] sm:$0xff] %vm913_vm4, %v5185_v0 }
  0x7f   : > { %4553 = vmatprep.subr.bf16.mxu0 %v5185_v0  ;;  %932 = vst.msk [vmem:[#allocation4 + $0x30] sm:$0xff] %vm913_vm4, %v5185_v0  ;;  %933 = vst.msk [vmem:[#allocation4 + $0x38] sm:$0xff] %vm913_vm4, %v5185_v0 }
  0x80   : > { %1047 = vmatpush1.bf16.msra.mxu1 %v4861_v13  ;;  %934 = vst.msk [vmem:[#allocation4 + $0x40] sm:$0xff] %vm913_vm4, %v5185_v0  ;;  %935 = vst.msk [vmem:[#allocation4 + $0x48] sm:$0xff] %vm913_vm4, %v5185_v0 }
  0x81   : > { %1048 = vmatprep.subr.bf16.mxu1 %v4863_v14  ;;  %936 = vst.msk [vmem:[#allocation4 + $0x50] sm:$0xff] %vm913_vm4, %v5185_v0  ;;  %937 = vst.msk [vmem:[#allocation4 + $0x58] sm:$0xff] %vm913_vm4, %v5185_v0 }
  0x82   : > { %4554 = vmatpush3.bf16.msra.mxu0 %v4862_v15 }
  0x83   : > { %4555 = vmatprep.subr.bf16.mxu0 %v5185_v0 }
  0x84   : > { %1049 = vmatpush1.bf16.msra.mxu1 %v4865_v16 }
  0x85   : > { %1050 = vmatprep.subr.bf16.mxu1 %v4867_v17 }
  0x86   : > { %4556 = vmatpush3.bf16.msra.mxu0 %v4866_v18 }
  0x87   : > { %4573 = vmatprep.subr.bf16.mxu0 %v5185_v0 }
  0x88   : > { %1051 = vmatpush1.bf16.msra.mxu1 %v4869_v20 }
  0x89   : > { %4558 = vmatmul.mubr.msk.bf16.vlgmr.msra.gmra.mxu0 %vm402_vm1, %v353_v22  ;;  %4561 = vmatprep.subr.bf16.mxu1 %v5185_v0 }
  0x8a   : > { %4575 = vmatprep.mubr.msk.bf16.mxu0 %vm5186_vm0, %v5185_v0 }
  0x8b   : > { %4417 = vmatmul.mubr.msk.bf16.vlgmr.msra.gmra.mxu1 %vm402_vm1, %v959_v23 }
  0x8c   : > { %4563 = vmatprep.mubr.msk.bf16.mxu1 %vm5186_vm0, %v5185_v0 }
 0x149   : > { %v5433_v24 = vpop.f32.mrf.mxu0 }
 0x14a   : > { %453 = vrot.lane.b32.xlu1 %v5433_v24, %s5188_s24  ;;  %447 = vrot.lane.b32.xlu0 %v5433_v24, %s5189_s26 }
 0x14b   : > { %v5437_v25 = vpop.f32.mrf.mxu1  ;;  %v4559_v26 = vpop.f32.mrf.mxu0 }
 0x14d   : > { %v5439_v27 = vpop.f32.mrf.mxu1  ;;  %v443_v28 = vpop.f32.mrf.mxu0 }
 0x14e   : > { %1078 = vrot.lane.b32.xlu1 %v5437_v25, %s5189_s26  ;;  %450 = vrot.lane.b32.xlu0 %v5433_v24, %s5190_s10 }
 0x14f   : > { %v1074_v29 = vpop.f32.mrf.mxu1  ;;  %v4560_v30 = vpop.f32.mrf.mxu0 }
 0x151   : > { %v1075_v31 = vpop.f32.mrf.mxu1 }
 0x152   : > { %1084 = vrot.lane.b32.xlu1 %v5437_v25, %s5188_s24  ;;  %1081 = vrot.lane.b32.xlu0 %v5437_v25, %s5190_s10  ;;  %s346_s24 = scalar_lea.vmem [#allocation15], %s5391_s15  ;;  %s5086_s15 = sshll.u32 %s5206_s21, 4  ;;  %s5087_s15 = int_to_ptr.vmem [resolvable:$false] %s5086_s15 }
 0x153   : > { %s4235_s26 = sshll.u32 %s346_s24, 4  ;;  %s6346_s26 = int_to_ptr.vmem [resolvable:$true] %s4235_s26 }
 0x154   : > { %p5089_p12 = scmp.lt.s32.totalorder %s6346_s26, %s5087_s15 }
 0x156   : > { %459 = vrot.lane.b32.xlu1 %v5433_v24, %s5191_s7  ;;  %456 = vrot.lane.b32.xlu0 %v5433_v24, %s5192_s2 }
 0x15a   : > { %465 = vrot.lane.b32.xlu1 %v5433_v24, %s5193_s3  ;;  %462 = vrot.lane.b32.xlu0 %v5433_v24, %s5194_s11 }
 0x15e   : > { %1090 = vrot.lane.b32.xlu1 %v5437_v25, %s5191_s7  ;;  %1087 = vrot.lane.b32.xlu0 %v5437_v25, %s5192_s2 }
 0x162   : > { %1096 = vrot.lane.b32.xlu1 %v5437_v25, %s5193_s3  ;;  %1093 = vrot.lane.b32.xlu0 %v5437_v25, %s5194_s11 }
 0x166   : > { %471 = vrot.lane.b32.xlu1 %v5433_v24, %s5195_s17  ;;  %468 = vrot.lane.b32.xlu0 %v5433_v24, %s5196_s13 }
 0x16a   : > { %477 = vrot.lane.b32.xlu1 %v5433_v24, %s5197_s29  ;;  %474 = vrot.lane.b32.xlu0 %v5433_v24, %s5198_s25 }
 0x16e   : > { %1102 = vrot.lane.b32.xlu1 %v5437_v25, %s5195_s17  ;;  %1099 = vrot.lane.b32.xlu0 %v5437_v25, %s5196_s13 }
 0x172   : > { %1108 = vrot.lane.b32.xlu1 %v5437_v25, %s5197_s29  ;;  %1105 = vrot.lane.b32.xlu0 %v5437_v25, %s5198_s25 }
 0x176   : > { %1532 = vrot.lane.b32.xlu1 %v5439_v27, %s5192_s2  ;;  %1534 = vrot.lane.b32.xlu0 %v5439_v27, %s5191_s7  ;;  %s6344_s2 = scalar_lea.hbm %s6398_s5, %s4480_s6 }
 0x17a   : > { %1536 = vrot.lane.b32.xlu1 %v5439_v27, %s5194_s11  ;;  %1542 = vrot.lane.b32.xlu0 %v5439_v27, %s5195_s17 }
 0x17e   : > { %1538 = vrot.lane.b32.xlu1 %v5439_v27, %s5193_s3 }
 0x182   : > { %1540 = vrot.lane.b32.xlu1 %v5439_v27, %s5196_s13 }
 0x186   : > { %1544 = vrot.lane.b32.xlu1 %v5439_v27, %s5198_s25 }
 0x1bc   : > { %v454_v39 = vpop.permute.xlu1 %453  ;;  %v448_v40 = vpop.permute.xlu0 %447 }
 0x1bd   : > { %v496_v43 = vcombine.low %v448_v40, %v454_v39  ;;  %v497_v44 = vcombine.high %v448_v40, %v454_v39 }
 0x1bf   : > { %v504_v50 = vrot.slane %v496_v43, %v5519_v42  ;;  %v511_v51 = vrot.slane %v497_v44, %v5519_v42 }
 0x1c0   : > { %v5521_v45 = vpop.permute.xlu1 %1078  ;;  %v451_v46 = vpop.permute.xlu0 %450 }
 0x1c1   : > { %v480_v47 = vcombine.low %v5433_v24, %v451_v46  ;;  %v481_v48 = vcombine.high %v5433_v24, %v451_v46 }
 0x1c3   : > { %v488_v52 = vrot.slane %v480_v47, %v5519_v42  ;;  %v495_v53 = vrot.slane %v481_v48, %v5519_v42 }
 0x1c4   : > { %v5532_v54 = vpop.permute.xlu1 %1084  ;;  %v5534_v55 = vpop.permute.xlu0 %1081 }
 0x1c5   : > { %v544_v56 = vcombine.low %v488_v52, %v504_v50  ;;  %v545_v57 = vcombine.high %v488_v52, %v504_v50  ;;  %v560_v58 = vcombine.low %v495_v53, %v511_v51  ;;  %v561_v59 = vcombine.high %v495_v53, %v511_v51 }
 0x1c6   : > { %v1127_v60 = vcombine.low %v5521_v45, %v5532_v54  ;;  %v1128_v61 = vcombine.high %v5521_v45, %v5532_v54  ;;  %v1111_v62 = vcombine.low %v5437_v25, %v5534_v55  ;;  %v1112_v63 = vcombine.high %v5437_v25, %v5534_v55 }
 0x1c7   : > { %v552_v1 = vrot.slane %v544_v56, %v5526_v49  ;;  %v559_v2 = vrot.slane %v545_v57, %v5526_v49  ;;  %v568_v3 = vrot.slane %v560_v58, %v5526_v49  ;;  %v575_v4 = vrot.slane %v561_v59, %v5526_v49 }
 0x1c8   : > { %v1135_v5 = vrot.slane %v1127_v60, %v5519_v42  ;;  %v1142_v6 = vrot.slane %v1128_v61, %v5519_v42  ;;  %v1119_v7 = vrot.slane %v1111_v62, %v5519_v42  ;;  %v1126_v8 = vrot.slane %v1112_v63, %v5519_v42  ;;  %v460_v9 = vpop.permute.xlu1 %459  ;;  %v457_v10 = vpop.permute.xlu0 %456 }
 0x1c9   : > { %v4395_v11 = vcombine.low %v552_v1, %v559_v2  ;;  %v4397_v12 = vcombine.high %v552_v1, %v559_v2  ;;  %v4399_v13 = vcombine.low %v568_v3, %v575_v4  ;;  %v4401_v14 = vcombine.high %v568_v3, %v575_v4 }
 0x1ca   : > { %v1175_v15 = vcombine.low %v1119_v7, %v1135_v5  ;;  %v1176_v16 = vcombine.high %v1119_v7, %v1135_v5  ;;  %v1191_v17 = vcombine.low %v1126_v8, %v1142_v6  ;;  %v1192_v18 = vcombine.high %v1126_v8, %v1142_v6 }
 0x1cb   : > { %v692_v19 = vrot.slane %v4395_v11, %v5519_v42  ;;  %v708_v20 = vrot.slane %v4397_v12, %v5519_v42  ;;  %v724_v21 = vrot.slane %v4399_v13, %v5519_v42  ;;  %v740_v22 = vrot.slane %v4401_v14, %v5519_v42 }
 0x1cc   : > { %v5557_v23 = vrot.slane %v1175_v15, %v5526_v49  ;;  %v5560_v24 = vrot.slane %v1176_v16, %v5526_v49  ;;  %v5563_v26 = vrot.slane %v1191_v17, %v5526_v49  ;;  %v5566_v28 = vrot.slane %v1192_v18, %v5526_v49  ;;  %v466_v29 = vpop.permute.xlu1 %465  ;;  %v463_v30 = vpop.permute.xlu0 %462 }
 0x1cd   : > { %v748_v31 = vcombine.low %v692_v19, %v708_v20  ;;  %v749_v32 = vcombine.high %v692_v19, %v708_v20  ;;  %v780_v33 = vcombine.low %v724_v21, %v740_v22  ;;  %v781_v35 = vcombine.high %v724_v21, %v740_v22 }
 0x1ce   : > { %v4418_v36 = vcombine.low %v5557_v23, %v5560_v24  ;;  %v4420_v37 = vcombine.high %v5557_v23, %v5560_v24  ;;  %v4422_v39 = vcombine.low %v5563_v26, %v5566_v28  ;;  %v4424_v40 = vcombine.high %v5563_v26, %v5566_v28 }
 0x1cf   : > { %v756_v41 = vrot.slane %v748_v31, %v5526_v49  ;;  %v763_v43 = vrot.slane %v749_v32, %v5526_v49  ;;  %v788_v44 = vrot.slane %v780_v33, %v5526_v49  ;;  %v795_v46 = vrot.slane %v781_v35, %v5526_v49 }
 0x1d0   : > { %v528_v47 = vcombine.low %v460_v9, %v466_v29  ;;  %v529_v48 = vcombine.high %v460_v9, %v466_v29  ;;  %v512_v50 = vcombine.low %v457_v10, %v463_v30  ;;  %v513_v51 = vcombine.high %v457_v10, %v463_v30  ;;  %v1091_v52 = vpop.permute.xlu1 %1090  ;;  %v1088_v53 = vpop.permute.xlu0 %1087 }
 0x1d1   : > { %v812_v56 = vcombine.low %v756_v41, %v788_v44  ;;  %v813_v57 = vcombine.high %v756_v41, %v788_v44  ;;  %v814_v58 = vcombine.low %v763_v43, %v795_v46  ;;  %v815_v59 = vcombine.high %v763_v43, %v795_v46 }
 0x1d2   : > { %v536_v60 = vrot.slane %v528_v47, %v5519_v42  ;;  %v543_v61 = vrot.slane %v529_v48, %v5519_v42  ;;  %v520_v62 = vrot.slane %v512_v50, %v5519_v42  ;;  %v527_v63 = vrot.slane %v513_v51, %v5519_v42 }
 0x1d3   : > { %v888_v1 = vpack.c.bf16 %v812_v56, %v812_v56  ;;  %v889_v2 = vpack.c.bf16 %v813_v57, %v813_v57  ;;  %v890_v3 = vpack.c.bf16 %v814_v58, %v814_v58  ;;  %v891_v4 = vpack.c.bf16 %v815_v59, %v815_v59 }
 0x1d4   : > { %v576_v5 = vcombine.low %v520_v62, %v536_v60  ;;  %v577_v6 = vcombine.high %v520_v62, %v536_v60  ;;  %v592_v7 = vcombine.low %v527_v63, %v543_v61  ;;  %v593_v8 = vcombine.high %v527_v63, %v543_v61  ;;  %v1097_v9 = vpop.permute.xlu1 %1096  ;;  %v1094_v10 = vpop.permute.xlu0 %1093 }
 0x1d5   : > { %901 = vst.msk [vmem:[#allocation2] sm:$0xf] %vm900_vm3, %v888_v1  ;;  %902 = vst.msk [vmem:[#allocation2 + $0x4] sm:$0xf] %vm900_vm3, %v889_v2  ;;  %v1159_v11 = vcombine.low %v1091_v52, %v1097_v9  ;;  %v1160_v12 = vcombine.high %v1091_v52, %v1097_v9  ;;  %v1143_v13 = vcombine.low %v1088_v53, %v1094_v10 }
 0x1d6   : > { %903 = vst.msk [vmem:[#allocation2 + $0x8] sm:$0xf] %vm900_vm3, %v890_v3  ;;  %904 = vst.msk [vmem:[#allocation2 + $0xc] sm:$0xf] %vm900_vm3, %v891_v4  ;;  %v1144_v14 = vcombine.high %v1088_v53, %v1094_v10  ;;  %v584_v15 = vrot.slane %v576_v5, %v5526_v49  ;;  %v591_v16 = vrot.slane %v577_v6, %v5526_v49 }
 0x1d7   : > { %v600_v17 = vrot.slane %v592_v7, %v5526_v49  ;;  %v607_v18 = vrot.slane %v593_v8, %v5526_v49  ;;  %v1167_v19 = vrot.slane %v1159_v11, %v5519_v42  ;;  %v1174_v20 = vrot.slane %v1160_v12, %v5519_v42 }
 0x1d8   : > { %v1151_v21 = vrot.slane %v1143_v13, %v5519_v42  ;;  %v1158_v22 = vrot.slane %v1144_v14, %v5519_v42  ;;  %v4396_v29 = vcombine.low %v584_v15, %v591_v16  ;;  %v4398_v30 = vcombine.high %v584_v15, %v591_v16  ;;  %v5596_v33 = vpop.permute.xlu1 %471  ;;  %v5598_v35 = vpop.permute.xlu0 %468 }
 0x1d9   : > { %v4400_v31 = vcombine.low %v600_v17, %v607_v18  ;;  %v4402_v32 = vcombine.high %v600_v17, %v607_v18  ;;  %v1323_v8 = vrot.slane %v4418_v36, %v5519_v42  ;;  %v1339_v9 = vrot.slane %v4420_v37, %v5519_v42 }
 0x1da   : > { %v1207_v41 = vcombine.low %v1151_v21, %v1167_v19  ;;  %v1208_v43 = vcombine.high %v1151_v21, %v1167_v19  ;;  %v1223_v44 = vcombine.low %v1158_v22, %v1174_v20  ;;  %v1224_v46 = vcombine.high %v1158_v22, %v1174_v20 }
 0x1db   : > { %v699_v47 = vrot.slane %v4396_v29, %v5519_v42  ;;  %v715_v48 = vrot.slane %v4398_v30, %v5519_v42  ;;  %v731_v50 = vrot.slane %v4400_v31, %v5519_v42  ;;  %v747_v51 = vrot.slane %v4402_v32, %v5519_v42 }
 0x1dc   : > { %v5605_v52 = vrot.slane %v1207_v41, %v5526_v49  ;;  %v5608_v53 = vrot.slane %v1208_v43, %v5526_v49  ;;  %v5611_v56 = vrot.slane %v1223_v44, %v5526_v49  ;;  %v5614_v57 = vrot.slane %v1224_v46, %v5526_v49  ;;  %v478_v62 = vpop.permute.xlu1 %477  ;;  %v475_v63 = vpop.permute.xlu0 %474 }
 0x1dd   : > { %v764_v58 = vcombine.low %v699_v47, %v715_v48  ;;  %v765_v59 = vcombine.high %v699_v47, %v715_v48  ;;  %v796_v60 = vcombine.low %v731_v50, %v747_v51  ;;  %v797_v61 = vcombine.high %v731_v50, %v747_v51 }
 0x1de   : > { %v4419_v1 = vcombine.low %v5605_v52, %v5608_v53  ;;  %v4421_v2 = vcombine.high %v5605_v52, %v5608_v53  ;;  %v4423_v3 = vcombine.low %v5611_v56, %v5614_v57  ;;  %v1355_v10 = vrot.slane %v4422_v39, %v5519_v42 }
 0x1df   : > { %v772_v4 = vrot.slane %v764_v58, %v5526_v49  ;;  %v779_v5 = vrot.slane %v765_v59, %v5526_v49  ;;  %v804_v6 = vrot.slane %v796_v60, %v5526_v49  ;;  %v811_v7 = vrot.slane %v797_v61, %v5526_v49 }
 0x1e0   : > { %v1371_v11 = vrot.slane %v4424_v40, %v5519_v42  ;;  %v1103_v36 = vpop.permute.xlu1 %1102  ;;  %v1379_v16 = vcombine.low %v1323_v8, %v1339_v9  ;;  %v1380_v18 = vcombine.high %v1323_v8, %v1339_v9  ;;  %v1100_v21 = vpop.permute.xlu0 %1099  ;;  %v632_v40 = vcombine.low %v5596_v33, %v478_v62 }
 0x1e1   : > { %v816_v12 = vcombine.low %v772_v4, %v804_v6  ;;  %v817_v13 = vcombine.high %v772_v4, %v804_v6  ;;  %v818_v14 = vcombine.low %v779_v5, %v811_v7  ;;  %v819_v15 = vcombine.high %v779_v5, %v811_v7 }
 0x1e2   : > { %v1411_v17 = vcombine.low %v1355_v10, %v1371_v11  ;;  %v1412_v23 = vcombine.high %v1355_v10, %v1371_v11  ;;  %v1387_v39 = vrot.slane %v1379_v16, %v5526_v49  ;;  %v1394_v26 = vrot.slane %v1380_v18, %v5526_v49 }
 0x1e3   : > { %v892_v24 = vpack.c.bf16 %v816_v12, %v816_v12  ;;  %v893_v37 = vpack.c.bf16 %v817_v13, %v817_v13  ;;  %v894_v19 = vpack.c.bf16 %v818_v14, %v818_v14  ;;  %v895_v20 = vpack.c.bf16 %v819_v15, %v819_v15 }
 0x1e4   : > { %v1419_v22 = vrot.slane %v1411_v17, %v5526_v49  ;;  %v1426_v28 = vrot.slane %v1412_v23, %v5526_v49  ;;  %v633_v29 = vcombine.high %v5596_v33, %v478_v62  ;;  %v616_v30 = vcombine.low %v5598_v35, %v475_v63  ;;  %v1109_v32 = vpop.permute.xlu1 %1108  ;;  %v1106_v4 = vpop.permute.xlu0 %1105 }
 0x1e5   : > { %905 = vst.msk [vmem:[#allocation2 + $0x10] sm:$0xf] %vm900_vm3, %v892_v24  ;;  %906 = vst.msk [vmem:[#allocation2 + $0x14] sm:$0xf] %vm900_vm3, %v893_v37  ;;  %v617_v31 = vcombine.high %v5598_v35, %v475_v63  ;;  %v1263_v46 = vcombine.low %v1103_v36, %v1109_v32  ;;  %v640_v47 = vrot.slane %v632_v40, %v5519_v42 }
 0x1e6   : > { %907 = vst.msk [vmem:[#allocation2 + $0x18] sm:$0xf] %vm900_vm3, %v894_v19  ;;  %908 = vst.msk [vmem:[#allocation2 + $0x1c] sm:$0xf] %vm900_vm3, %v895_v20  ;;  %v1443_v41 = vcombine.low %v1387_v39, %v1419_v22  ;;  %v1445_v43 = vcombine.low %v1394_v26, %v1426_v28  ;;  %v1444_v44 = vcombine.high %v1387_v39, %v1419_v22 }
 0x1e7   : > { %v647_v48 = vrot.slane %v633_v29, %v5519_v42  ;;  %v624_v50 = vrot.slane %v616_v30, %v5519_v42  ;;  %v631_v51 = vrot.slane %v617_v31, %v5519_v42  ;;  %v4425_v33 = vcombine.high %v5611_v56, %v5614_v57  ;;  %v2004_v31 = vld [vmem:[#allocation2] sm:$0xf] }
 0x1e8   : > { %v1519_v58 = vpack.c.bf16 %v1443_v41, %v1443_v41  ;;  %v1521_v59 = vpack.c.bf16 %v1445_v43, %v1445_v43  ;;  %v1264_v60 = vcombine.high %v1103_v36, %v1109_v32  ;;  %v1520_v7 = vpack.c.bf16 %v1444_v44, %v1444_v44  ;;  %v2006_v32 = vld [vmem:[#allocation2 + $0x8] sm:$0xf] }
 0x1e9   : > { %v648_v35 = vcombine.low %v624_v50, %v640_v47  ;;  %v649_v61 = vcombine.high %v624_v50, %v640_v47  ;;  %v664_v62 = vcombine.low %v631_v51, %v647_v48  ;;  %v665_v63 = vcombine.high %v631_v51, %v647_v48 }
 0x1ea   : > { %v2031_v5 = vsel %vm938_vm2, %v1519_v58, 0  ;;  %v2123_v6 = vsel %vm938_vm2, %v1521_v59, 0  ;;  %v1271_v8 = vrot.slane %v1263_v46, %v5519_v42  ;;  %v1278_v13 = vrot.slane %v1264_v60, %v5519_v42 }
 0x1eb   : > { %4562 = vmatpush3.bf16.xpose.msra.mxu1 %v2031_v5  ;;  %4574 = vmatpush3.bf16.xpose.msra.mxu0 %v2123_v6  ;;  %v656_v9 = vrot.slane %v648_v35, %v5526_v49  ;;  %v663_v10 = vrot.slane %v649_v61, %v5526_v49  ;;  %v672_v11 = vrot.slane %v664_v62, %v5526_v49  ;;  %v2077_v52 = vsel %vm938_vm2, %v1520_v7, 0 }
 0x1ec   : > { %v679_v12 = vrot.slane %v665_v63, %v5526_v49  ;;  %4567 = vmatprep.subr.bf16.mxu1 %v5185_v0  ;;  %v1247_v14 = vcombine.low %v1100_v21, %v1106_v4  ;;  %v1248_v15 = vcombine.high %v1100_v21, %v1106_v4  ;;  %4585 = vmatprep.subr.bf16.mxu0 %v5185_v0 }
 0x1ed   : > { %v820_v36 = vcombine.low %v656_v9, %v663_v10  ;;  %v4403_v16 = vcombine.high %v656_v9, %v663_v10  ;;  %v1446_v17 = vcombine.high %v1394_v26, %v1426_v28  ;;  %v5674_v18 = vrot.slane %v4419_v1, %v5519_v42 }
 0x1ee   : > { %v836_v23 = vcombine.low %v672_v11, %v679_v12  ;;  %v4404_v24 = vcombine.high %v672_v11, %v679_v12  ;;  %v1255_v37 = vrot.slane %v1247_v14, %v5519_v42  ;;  %v1262_v19 = vrot.slane %v1248_v15, %v5519_v42 }
 0x1ef   : > { %v827_v20 = vrot.slane %v820_v36, %v5519_v42  ;;  %v835_v21 = vrot.slane %v4403_v16, %v5519_v42  ;;  %v1522_v39 = vpack.c.bf16 %v1446_v17, %v1446_v17  ;;  %v5684_v22 = vrot.slane %v4421_v2, %v5519_v42 }
 0x1f0   : > { %v843_v1 = vrot.slane %v836_v23, %v5519_v42  ;;  %v851_v26 = vrot.slane %v4404_v24, %v5519_v42  ;;  %v1279_v28 = vcombine.low %v1255_v37, %v1271_v8  ;;  %v1280_v40 = vcombine.high %v1255_v37, %v1271_v8 }
 0x1f1   : > { %v852_v29 = vcombine.low %v827_v20, %v835_v21  ;;  %v853_v30 = vcombine.high %v827_v20, %v835_v21  ;;  %v1295_v41 = vcombine.low %v1262_v19, %v1278_v13  ;;  %v1296_v43 = vcombine.high %v1262_v19, %v1278_v13  ;;  %v2005_v13 = vld [vmem:[#allocation2 + $0x4] sm:$0xf] }
 0x1f2   : > { %v868_v44 = vcombine.low %v843_v1, %v851_v26  ;;  %v869_v46 = vcombine.high %v843_v1, %v851_v26  ;;  %4564 = vmatmul.mubr.msk.bf16.vlgmr.msra.gmra.mxu1 %vm938_vm2, %v2004_v31  ;;  %4576 = vmatmul.mubr.msk.bf16.vlgmr.msra.gmra.mxu0 %vm938_vm2, %v2006_v32  ;;  %v1287_v53 = vrot.slane %v1279_v28, %v5526_v49  ;;  %v2169_v14 = vsel %vm938_vm2, %v1522_v39, 0  ;;  %v2007_v28 = vld [vmem:[#allocation2 + $0xc] sm:$0xf] }
 0x1f3   : > { %v860_v2 = vrot.slane %v852_v29, %v5526_v49  ;;  %v867_v47 = vrot.slane %v853_v30, %v5526_v49  ;;  %4568 = vmatpush3.bf16.xpose.msra.mxu1 %v2077_v52  ;;  %v1294_v48 = vrot.slane %v1280_v40, %v5526_v49  ;;  %v1303_v50 = vrot.slane %v1295_v41, %v5526_v49 }
 0x1f4   : > { %v876_v51 = vrot.slane %v868_v44, %v5526_v49  ;;  %v883_v58 = vrot.slane %v869_v46, %v5526_v49  ;;  %v1310_v59 = vrot.slane %v1296_v43, %v5526_v49  ;;  %4569 = vmatprep.mubr.msk.bf16.mxu1 %vm5186_vm0, %v5185_v0  ;;  %4579 = vmatprep.subr.bf16.mxu1 %v5185_v0  ;;  %v2008_v46 = vld [vmem:[#allocation2 + $0x10] sm:$0xf] }
 0x1f5   : > { %v1451_v60 = vcombine.low %v1287_v53, %v1294_v48  ;;  %v4426_v35 = vcombine.high %v1287_v53, %v1294_v48  ;;  %v1362_v61 = vrot.slane %v4423_v3, %v5519_v42  ;;  %v1378_v62 = vrot.slane %v4425_v33, %v5519_v42  ;;  %4587 = vmatprep.mubr.msk.bf16.mxu0 %vm5186_vm0, %v5185_v0 }
 0x1f6   : > { %v884_v63 = vcombine.low %v860_v2, %v876_v51  ;;  %v885_v4 = vcombine.high %v860_v2, %v876_v51  ;;  %v886_v5 = vcombine.low %v867_v47, %v883_v58  ;;  %v887_v6 = vcombine.high %v867_v47, %v883_v58  ;;  %v2009_v47 = vld [vmem:[#allocation2 + $0x14] sm:$0xf] }
 0x1f7   : > { %v1467_v7 = vcombine.low %v1303_v50, %v1310_v59  ;;  %v4427_v8 = vcombine.high %v1303_v50, %v1310_v59  ;;  %v1458_v3 = vrot.slane %v1451_v60, %v5519_v42  ;;  %v1395_v56 = vcombine.low %v5674_v18, %v5684_v22 }
 0x1f8   : > { %v896_v9 = vpack.c.bf16 %v884_v63, %v884_v63  ;;  %v897_v10 = vpack.c.bf16 %v885_v4, %v885_v4  ;;  %v898_v11 = vpack.c.bf16 %v886_v5, %v886_v5  ;;  %v899_v12 = vpack.c.bf16 %v887_v6, %v887_v6  ;;  %v2011_v63 = vld [vmem:[#allocation2 + $0x1c] sm:$0xf] }
 0x1f9   : > { %v1427_v57 = vcombine.low %v1362_v61, %v1378_v62  ;;  %v1466_v33 = vrot.slane %v4426_v35, %v5519_v42  ;;  %v1474_v15 = vrot.slane %v1467_v7, %v5519_v42  ;;  %v1396_v36 = vcombine.high %v5674_v18, %v5684_v22 }
 0x1fa   : > { %909 = vst.msk [vmem:[#allocation2 + $0x20] sm:$0xf] %vm900_vm3, %v896_v9  ;;  %910 = vst.msk [vmem:[#allocation2 + $0x24] sm:$0xf] %vm900_vm3, %v897_v10  ;;  %4570 = vmatmul.mubr.msk.bf16.vlgmr.msra.gmra.mxu1 %vm938_vm2, %v2005_v13  ;;  %v1428_v16 = vcombine.high %v1362_v61, %v1378_v62  ;;  %v1482_v17 = vrot.slane %v4427_v8, %v5519_v42  ;;  %v1403_v23 = vrot.slane %v1395_v56, %v5526_v49  ;;  %v2010_v61 = vld [vmem:[#allocation2 + $0x18] sm:$0xf] }
 0x1fb   : > { %911 = vst.msk [vmem:[#allocation2 + $0x28] sm:$0xf] %vm900_vm3, %v898_v11  ;;  %912 = vst.msk [vmem:[#allocation2 + $0x2c] sm:$0xf] %vm900_vm3, %v899_v12  ;;  %4580 = vmatpush3.bf16.xpose.msra.mxu1 %v2169_v14  ;;  %v1435_v24 = vrot.slane %v1427_v57, %v5526_v49  ;;  %4581 = vmatprep.mubr.msk.bf16.mxu1 %vm5186_vm0, %v5185_v0  ;;  %v1410_v20 = vrot.slane %v1396_v36, %v5526_v49  ;;  %v5201_v13 = vmov -1e+30  }
 0x1fc   : > { %4591 = vmatprep.subr.bf16.mxu1 %v5185_v0  ;;  %v1442_v21 = vrot.slane %v1428_v16, %v5526_v49  ;;  %v1483_v22 = vcombine.low %v1458_v3, %v1466_v33  ;;  %v1499_v1 = vcombine.low %v1474_v15, %v1482_v17  ;;  %v1484_v53 = vcombine.high %v1458_v3, %v1466_v33 }
 0x1fd   : > { %v1447_v37 = vcombine.low %v1403_v23, %v1435_v24  ;;  %v1448_v19 = vcombine.high %v1403_v23, %v1435_v24  ;;  %v1500_v2 = vcombine.high %v1474_v15, %v1482_v17  ;;  %914 = vst.msk [vmem:[#allocation3] sm:$0xff] %vm913_vm4, %v5201_v13  ;;  %915 = vst.msk [vmem:[#allocation3 + $0x8] sm:$0xff] %vm913_vm4, %v5201_v13  ;;  %v2021_v14 = vand.u32 127, %v485_v34 }
 0x1fe   : > { %v1449_v40 = vcombine.low %v1410_v20, %v1442_v21  ;;  %v1450_v30 = vcombine.high %v1410_v20, %v1442_v21  ;;  %v1491_v31 = vrot.slane %v1483_v22, %v5526_v49  ;;  %v1507_v32 = vrot.slane %v1499_v1, %v5526_v49  ;;  %916 = vst.msk [vmem:[#allocation3 + $0x10] sm:$0xff] %vm913_vm4, %v5201_v13 }
 0x1ff   : > { %v1523_v18 = vpack.c.bf16 %v1447_v37, %v1447_v37  ;;  %v1524_v39 = vpack.c.bf16 %v1448_v19, %v1448_v19  ;;  %v1498_v58 = vrot.slane %v1484_v53, %v5526_v49  ;;  %v1514_v59 = vrot.slane %v1500_v2, %v5526_v49  ;;  %917 = vst.msk [vmem:[#allocation3 + $0x18] sm:$0xff] %vm913_vm4, %v5201_v13 }
 0x200   : > { %v1525_v41 = vpack.c.bf16 %v1449_v40, %v1449_v40  ;;  %v1526_v43 = vpack.c.bf16 %v1450_v30, %v1450_v30  ;;  %v1515_v44 = vcombine.low %v1491_v31, %v1507_v32  ;;  %v1516_v51 = vcombine.high %v1491_v31, %v1507_v32  ;;  %918 = vst.msk [vmem:[#allocation3 + $0x20] sm:$0xff] %vm913_vm4, %v5201_v13 }
 0x201   : > { %v2215_v26 = vsel %vm938_vm2, %v1523_v18, 0  ;;  %v2261_v29 = vsel %vm938_vm2, %v1524_v39, 0  ;;  %v1517_v62 = vcombine.low %v1498_v58, %v1514_v59  ;;  %v1518_v5 = vcombine.high %v1498_v58, %v1514_v59  ;;  %v2012_v8 = vld [vmem:[#allocation2 + $0x20] sm:$0xf]  ;;  %v2013_v10 = vld [vmem:[#allocation2 + $0x24] sm:$0xf] }
 0x202   : > { %4586 = vmatpush3.bf16.xpose.msra.mxu0 %v2215_v26  ;;  %4582 = vmatmul.mubr.msk.bf16.vlgmr.msra.gmra.mxu1 %vm938_vm2, %v2007_v28  ;;  %v2307_v52 = vsel %vm938_vm2, %v1525_v41, 0  ;;  %v2353_v48 = vsel %vm938_vm2, %v1526_v43, 0  ;;  %v1527_v50 = vpack.c.bf16 %v1515_v44, %v1515_v44  ;;  %v1528_v35 = vpack.c.bf16 %v1516_v51, %v1516_v51  ;;  %v2014_v12 = vld [vmem:[#allocation2 + $0x28] sm:$0xf]  ;;  %v2015_v3 = vld [vmem:[#allocation2 + $0x2c] sm:$0xf] }
 0x203   : > { %4597 = vmatprep.subr.bf16.mxu0 %v5185_v0  ;;  %4592 = vmatpush3.bf16.xpose.msra.mxu1 %v2261_v29  ;;  %v1529_v6 = vpack.c.bf16 %v1517_v62, %v1517_v62  ;;  %v1530_v7 = vpack.c.bf16 %v1518_v5, %v1518_v5  ;;  %919 = vst.msk [vmem:[#allocation3 + $0x28] sm:$0xff] %vm913_vm4, %v5201_v13  ;;  %920 = vst.msk [vmem:[#allocation3 + $0x30] sm:$0xff] %vm913_vm4, %v5201_v13 }
 0x204   : > { %4593 = vmatprep.mubr.msk.bf16.mxu1 %vm5186_vm0, %v5185_v0  ;;  %4603 = vmatprep.subr.bf16.mxu1 %v5185_v0  ;;  %v2399_v60 = vsel %vm938_vm2, %v1527_v50, 0  ;;  %v2445_v4 = vsel %vm938_vm2, %v1528_v35, 0  ;;  %921 = vst.msk [vmem:[#allocation3 + $0x38] sm:$0xff] %vm913_vm4, %v5201_v13  ;;  %922 = vst.msk [vmem:[#allocation3 + $0x40] sm:$0xff] %vm913_vm4, %v5201_v13  ;;  %vm2024_vm5 = vcmp.gt.s32.totalorder %v2021_v14, %v5516_v38 }
 0x205   : > { %v2491_v9 = vsel %vm938_vm2, %v1529_v6, 0  ;;  %v2537_v11 = vsel %vm938_vm2, %v1530_v7, 0  ;;  %923 = vst.msk [vmem:[#allocation3 + $0x48] sm:$0xff] %vm913_vm4, %v5201_v13  ;;  %924 = vst.msk [vmem:[#allocation3 + $0x50] sm:$0xff] %vm913_vm4, %v5201_v13  ;;  %v5819_v56 = vsel %vm2024_vm5, -1e+09, %v5185_v0 }
 0x206   : > { %925 = vst.msk [vmem:[#allocation3 + $0x58] sm:$0xff] %vm913_vm4, %v5201_v13 }
 0x209   : > { %4588 = vmatmul.mubr.msk.bf16.vlgmr.msra.gmra.mxu0 %vm938_vm2, %v2008_v46 }
 0x20a   : > { %4598 = vmatpush3.bf16.xpose.msra.mxu0 %v2307_v52  ;;  %4599 = vmatprep.mubr.msk.bf16.mxu0 %vm5186_vm0, %v5185_v0 }
 0x20b   : > { %4594 = vmatmul.mubr.msk.bf16.vlgmr.msra.gmra.mxu1 %vm938_vm2, %v2009_v47  ;;  %4609 = vmatprep.subr.bf16.mxu0 %v5185_v0 }
 0x20c   : > { %4604 = vmatpush3.bf16.xpose.msra.mxu1 %v2353_v48  ;;  %4605 = vmatprep.mubr.msk.bf16.mxu1 %vm5186_vm0, %v5185_v0 }
 0x20d   : > { %4615 = vmatprep.subr.bf16.mxu1 %v5185_v0 }
 0x211   : > { %4600 = vmatmul.mubr.msk.bf16.vlgmr.msra.gmra.mxu0 %vm938_vm2, %v2010_v61 }
 0x212   : > { %4610 = vmatpush3.bf16.xpose.msra.mxu0 %v2399_v60  ;;  %4611 = vmatprep.mubr.msk.bf16.mxu0 %vm5186_vm0, %v5185_v0 }
 0x213   : > { %4606 = vmatmul.mubr.msk.bf16.vlgmr.msra.gmra.mxu1 %vm938_vm2, %v2011_v63  ;;  %4621 = vmatprep.subr.bf16.mxu0 %v5185_v0 }
 0x214   : > { %4616 = vmatpush3.bf16.xpose.msra.mxu1 %v2445_v4  ;;  %4617 = vmatprep.mubr.msk.bf16.mxu1 %vm5186_vm0, %v5185_v0 }
 0x215   : > { %4627 = vmatprep.subr.bf16.mxu1 %v5185_v0 }
 0x219   : > { %4612 = vmatmul.mubr.msk.bf16.vlgmr.msra.gmra.mxu0 %vm938_vm2, %v2012_v8 }
 0x21a   : > { %4622 = vmatpush3.bf16.xpose.msra.mxu0 %v2491_v9  ;;  %4623 = vmatprep.mubr.msk.bf16.mxu0 %vm5186_vm0, %v5185_v0 }
 0x21b   : > { %4618 = vmatmul.mubr.msk.bf16.vlgmr.msra.gmra.mxu1 %vm938_vm2, %v2013_v10  ;;  %4633 = vmatprep.subr.bf16.mxu0 %v5185_v0 }
 0x21c   : > { %4628 = vmatpush3.bf16.xpose.msra.mxu1 %v2537_v11  ;;  %4629 = vmatprep.mubr.msk.bf16.mxu1 %vm5186_vm0, %v5185_v0 }
 0x21d   : > { %4639 = vmatprep.subr.bf16.mxu1 %v5185_v0 }
 0x221   : > { %4624 = vmatmul.mubr.msk.bf16.vlgmr.msra.gmra.mxu0 %vm938_vm2, %v2014_v12 }
 0x222   : > { %4635 = vmatprep.mubr.msk.bf16.mxu0 %vm5186_vm0, %v5185_v0 }
 0x223   : > { %4630 = vmatmul.mubr.msk.bf16.vlgmr.msra.gmra.mxu1 %vm938_vm2, %v2015_v3 }
 0x224   : > { %4641 = vmatprep.mubr.msk.bf16.mxu1 %vm5186_vm0, %v5185_v0 }
 0x2b2   : > { %v2067_v57 = vpop.f32.mrf.mxu1  ;;  %v2159_v33 = vpop.f32.mrf.mxu0 }
 0x2b3   : > { %v5822_v15 = vadd.f32 %v2067_v57, %v5819_v56  ;;  %v5825_v17 = vadd.f32 %v2159_v33, %v5819_v56 }
 0x2b4   : > { %v4565_v36 = vpop.f32.mrf.mxu1  ;;  %v4577_v16 = vpop.f32.mrf.mxu0 }
 0x2b5   : > { %v2591_v23 = vsel %vm938_vm2, %v5822_v15, -inf  ;;  %v2597_v19 = vsel %vm938_vm2, %v5825_v17, -inf }
 0x2b6   : > { %2592 = vmax.xlane.f32.xlu0 %v2591_v23  ;;  %v2070_v34 = vpop.f32.mrf.mxu1  ;;  %v2162_v24 = vpop.f32.mrf.mxu0 }
 0x2b8   : > { %v4566_v38 = vpop.f32.mrf.mxu1  ;;  %v4578_v37 = vpop.f32.mrf.mxu0 }
 0x2ba   : > { %v2113_v20 = vpop.f32.mrf.mxu1  ;;  %2598 = vmax.xlane.f32.xlu0 %v2597_v19 }
 0x2bb   : > { %v5832_v21 = vadd.f32 %v2113_v20, %v5819_v56 }
 0x2bc   : > { %v4571_v18 = vpop.f32.mrf.mxu1 }
 0x2bd   : > { %v2594_v39 = vsel %vm938_vm2, %v5832_v21, -inf }
 0x2be   : > { %2595 = vmax.xlane.f32.xlu1 %v2594_v39  ;;  %v2116_v22 = vpop.f32.mrf.mxu1 }
 0x2c0   : > { %v4572_v1 = vpop.f32.mrf.mxu1 }
 0x2c2   : > { %v2205_v26 = vpop.f32.mrf.mxu1 }
 0x2c3   : > { %v5837_v28 = vadd.f32 %v2205_v26, %v5819_v56 }
 0x2c4   : > { %v4583_v40 = vpop.f32.mrf.mxu1 }
 0x2c5   : > { %v2600_v29 = vsel %vm938_vm2, %v5837_v28, -inf  ;;  %v1533_v40 = vpop.permute.xlu1 %1532 }
 0x2c6   : > { %v2208_v30 = vpop.f32.mrf.mxu1  ;;  %2601 = vmax.xlane.f32.xlu0 %v2600_v29 }
 0x2c8   : > { %v4584_v31 = vpop.f32.mrf.mxu1 }
 0x2c9   : > { %v2251_v32 = vpop.f32.mrf.mxu0  ;;  %v1537_v29 = vpop.permute.xlu1 %1536 }
 0x2ca   : > { %v5842_v41 = vadd.f32 %v2251_v32, %v5819_v56 }
 0x2cb   : > { %v4589_v43 = vpop.f32.mrf.mxu0  ;;  %v2297_v44 = vpop.f32.mrf.mxu1 }
 0x2cc   : > { %v2603_v46 = vsel %vm938_vm2, %v5842_v41, -inf  ;;  %v5847_v52 = vadd.f32 %v2297_v44, %v5819_v56  ;;  %v5889_v43 = vld [vmem:[#allocation3] sm:$0xff] }
 0x2cd   : > { %2604 = vmax.xlane.f32.xlu1 %v2603_v46  ;;  %v2254_v53 = vpop.f32.mrf.mxu0  ;;  %v4595_v2 = vpop.f32.mrf.mxu1  ;;  %v5894_v46 = vld [vmem:[#allocation3 + $0x10] sm:$0xff] }
 0x2ce   : > { %v2606_v47 = vsel %vm938_vm2, %v5847_v52, -inf  ;;  %v1539_v30 = vpop.permute.xlu1 %1538 }
 0x2cf   : > { %v4590_v48 = vpop.f32.mrf.mxu0  ;;  %v2300_v50 = vpop.f32.mrf.mxu1  ;;  %2607 = vmax.xlane.f32.xlu0 %v2606_v47 }
 0x2d0   : > { %v5904_v48 = vld [vmem:[#allocation3 + $0x8] sm:$0xff] }
 0x2d1   : > { %v2343_v51 = vpop.f32.mrf.mxu0  ;;  %v4596_v58 = vpop.f32.mrf.mxu1 }
 0x2d2   : > { %v5852_v59 = vadd.f32 %v2343_v51, %v5819_v56  ;;  %v1541_v32 = vpop.permute.xlu1 %1540 }
 0x2d3   : > { %v4601_v60 = vpop.f32.mrf.mxu0  ;;  %v2389_v35 = vpop.f32.mrf.mxu1 }
 0x2d4   : > { %v2609_v61 = vsel %vm938_vm2, %v5852_v59, -inf  ;;  %v5860_v11 = vadd.f32 %v2389_v35, %v5819_v56  ;;  %v5920_v35 = vld [vmem:[#allocation3 + $0x18] sm:$0xff] }
 0x2d5   : > { %2610 = vmax.xlane.f32.xlu1 %v2609_v61  ;;  %v2346_v62 = vpop.f32.mrf.mxu0  ;;  %v4607_v63 = vpop.f32.mrf.mxu1 }
 0x2d6   : > { %v2612_v33 = vsel %vm938_vm2, %v5860_v11, -inf  ;;  %v5933_v63 = vld [vmem:[#allocation3 + $0x20] sm:$0xff] }
 0x2d7   : > { %v4602_v4 = vpop.f32.mrf.mxu0  ;;  %v2392_v5 = vpop.f32.mrf.mxu1 }
 0x2d9   : > { %v2435_v6 = vpop.f32.mrf.mxu0  ;;  %v4608_v7 = vpop.f32.mrf.mxu1 }
 0x2da   : > { %v5857_v8 = vadd.f32 %v2435_v6, %v5819_v56 }
 0x2db   : > { %v4613_v9 = vpop.f32.mrf.mxu0  ;;  %v2481_v10 = vpop.f32.mrf.mxu1 }
 0x2dc   : > { %v2615_v12 = vsel %vm938_vm2, %v5857_v8, -inf  ;;  %v5876_v22 = vadd.f32 %v2481_v10, %v5819_v56 }
 0x2dd   : > { %2616 = vmax.xlane.f32.xlu0 %v2615_v12  ;;  %v2438_v3 = vpop.f32.mrf.mxu0  ;;  %v4619_v13 = vpop.f32.mrf.mxu1  ;;  %v5955_v12 = vld [vmem:[#allocation3 + $0x30] sm:$0xff] }
 0x2de   : > { %v2618_v1 = vsel %vm938_vm2, %v5876_v22, -inf }
 0x2df   : > { %v4614_v14 = vpop.f32.mrf.mxu0  ;;  %v2484_v57 = vpop.f32.mrf.mxu1 }
 0x2e0   : > { %v5967_v57 = vld [vmem:[#allocation3 + $0x40] sm:$0xff] }
 0x2e1   : > { %2613 = vmax.xlane.f32.xlu0 %v2612_v33  ;;  %v2527_v36 = vpop.f32.mrf.mxu0  ;;  %v4620_v16 = vpop.f32.mrf.mxu1 }
 0x2e2   : > { %v5867_v23 = vadd.f32 %v2527_v36, %v5819_v56  ;;  %v5973_v16 = vld [vmem:[#allocation3 + $0x38] sm:$0xff] }
 0x2e3   : > { %v4625_v34 = vpop.f32.mrf.mxu0  ;;  %v2573_v24 = vpop.f32.mrf.mxu1 }
 0x2e4   : > { %v2621_v38 = vsel %vm938_vm2, %v5867_v23, -inf  ;;  %v5881_v26 = vadd.f32 %v2573_v24, %v5819_v56 }
 0x2e5   : > { %2622 = vmax.xlane.f32.xlu0 %v2621_v38  ;;  %v2530_v37 = vpop.f32.mrf.mxu0  ;;  %v4631_v19 = vpop.f32.mrf.mxu1 }
 0x2e6   : > { %1546 = vrot.lane.b32.xlu1 %v5439_v27, %s5197_s29  ;;  %v2624_v27 = vsel %vm938_vm2, %v5881_v26, -inf  ;;  %v5983_v37 = vld [vmem:[#allocation3 + $0x50] sm:$0xff] }
 0x2e7   : > { %v4626_v20 = vpop.f32.mrf.mxu0  ;;  %v2576_v18 = vpop.f32.mrf.mxu1 }
 0x2e9   : > { %v4632_v39 = vpop.f32.mrf.mxu1 }
 0x2fb   : > { %1550 = vrot.lane.b32.xlu0 %v5521_v45, %s5202_s30  ;;  %v1535_v45 = vpop.permute.xlu0 %1534 }
 0x2ff   : > { %v5887_v31 = vpop.permute.xlu0 %1542 }
 0x30a   : > { %2619 = vmax.xlane.f32.xlu1 %v2618_v1 }
 0x31a   : > { %2625 = vmax.xlane.f32.xlu0 %v2624_v27  ;;  %v6001_v27 = vld [vmem:[#allocation3 + $0x48] sm:$0xff] }
 0x31b   : > { %1548 = vrot.lane.b32.xlu1 %v5437_v25, %s5202_s30  ;;  %v1545_v25 = vpop.permute.xlu1 %1544 }
 0x33f   : > { %v2593_v44 = vpop.xlane.xlu0 %2592 }
 0x340   : > { %v5892_v56 = vmax.f32 %v5889_v43, %v2593_v44 }
 0x342   : > { %v2639_v53 = vsub.f32 %v5889_v43, %v5892_v56  ;;  %3529 = vst.msk [vmem:[#allocation3] sm:$0xff] %vm913_vm4, %v5892_v56  ;;  %2677 = vperm.xlu0 %4844, %v5892_v56  }
 0x343   : > { %v2599_v2 = vpop.xlane.xlu0 %2598 }
 0x344   : > { %v5902_v47 = vmax.f32 %v5894_v46, %v2599_v2 }
 0x346   : > { %3531 = vst.msk [vmem:[#allocation3 + $0x10] sm:$0xff] %vm913_vm4, %v5902_v47  ;;  %1554 = vrot.lane.b32.xlu0 %v5532_v54, %s5202_s30 }
 0x347   : > { %v2596_v51 = vpop.xlane.xlu1 %2595 }
 0x348   : > { %v5913_v58 = vmax.f32 %v5904_v48, %v2596_v51 }
 0x34a   : > { %3530 = vst.msk [vmem:[#allocation3 + $0x8] sm:$0xff] %vm913_vm4, %v5913_v58  ;;  %2682 = vperm.xlu1 %4845, %v5913_v58  }
 0x34e   : > { %1552 = vrot.lane.b32.xlu1 %v5534_v55, %s5202_s30  ;;  %v5937_v55 = vld [vmem:[#allocation3 + $0x28] sm:$0xff] }
 0x34f   : > { %v2602_v61 = vpop.xlane.xlu0 %2601 }
 0x350   : > { %v5925_v54 = vmax.f32 %v5920_v35, %v2602_v61 }
 0x352   : > { %v2642_v62 = vsub.f32 %v5920_v35, %v5925_v54  ;;  %3532 = vst.msk [vmem:[#allocation3 + $0x18] sm:$0xff] %vm913_vm4, %v5925_v54  ;;  %2687 = vperm.xlu1 %4845, %v5902_v47   ;;  %2692 = vperm.xlu0 %4844, %v5925_v54  }
 0x356   : > { %v2605_v4 = vpop.xlane.xlu1 %2604  ;;  %1556 = vrot.lane.b32.xlu1 %v1533_v40, %s5202_s30  ;;  %1558 = vrot.lane.b32.xlu0 %v1535_v45, %s5202_s30 }
 0x357   : > { %v5940_v5 = vmax.f32 %v5933_v63, %v2605_v4 }
 0x358   : > { %v2608_v6 = vpop.xlane.xlu0 %2607 }
 0x359   : > { %3533 = vst.msk [vmem:[#allocation3 + $0x20] sm:$0xff] %vm913_vm4, %v5940_v5  ;;  %v5947_v9 = vmax.f32 %v5937_v55, %v2608_v6 }
 0x35a   : > { %2697 = vperm.xlu1 %4845, %v5940_v5  }
 0x35b   : > { %v2644_v10 = vsub.f32 %v5937_v55, %v5947_v9  ;;  %3534 = vst.msk [vmem:[#allocation3 + $0x28] sm:$0xff] %vm913_vm4, %v5947_v9  ;;  %2702 = vperm.xlu0 %4844, %v5947_v9  }
 0x35e   : > { %v2611_v3 = vpop.xlane.xlu1 %2610  ;;  %1560 = vrot.lane.b32.xlu1 %v1537_v29, %s5202_s30 }
 0x35f   : > { %v5959_v13 = vmax.f32 %v5955_v12, %v2611_v3  ;;  %1562 = vrot.lane.b32.xlu0 %v1539_v30, %s5202_s30 }
 0x361   : > { %3535 = vst.msk [vmem:[#allocation3 + $0x30] sm:$0xff] %vm913_vm4, %v5959_v13 }
 0x362   : > { %2707 = vperm.xlu1 %4845, %v5959_v13   ;;  %v1547_v1 = vpop.permute.xlu1 %1546 }
 0x366   : > { %v2617_v33 = vpop.xlane.xlu0 %2616  ;;  %1564 = vrot.lane.b32.xlu1 %v1541_v32, %s5202_s30 }
 0x367   : > { %v5971_v36 = vmax.f32 %v5967_v57, %v2617_v33 }
 0x369   : > { %3537 = vst.msk [vmem:[#allocation3 + $0x40] sm:$0xff] %vm913_vm4, %v5971_v36 }
 0x36a   : > { %v2614_v24 = vpop.xlane.xlu0 %2613  ;;  %2717 = vperm.xlu1 %4845, %v5971_v36  }
 0x36b   : > { %v5981_v38 = vmax.f32 %v5973_v16, %v2614_v24 }
 0x36d   : > { %v2646_v19 = vsub.f32 %v5973_v16, %v5981_v38  ;;  %3536 = vst.msk [vmem:[#allocation3 + $0x38] sm:$0xff] %vm913_vm4, %v5981_v38  ;;  %2712 = vperm.xlu0 %4844, %v5981_v38  }
 0x36e   : > { %v2623_v20 = vpop.xlane.xlu0 %2622  ;;  %1568 = vrot.lane.b32.xlu1 %v1545_v25, %s5202_s30 }
 0x36f   : > { %v5992_v18 = vmax.f32 %v5983_v37, %v2623_v20 }
 0x371   : > { %3539 = vst.msk [vmem:[#allocation3 + $0x50] sm:$0xff] %vm913_vm4, %v5992_v18  ;;  %1566 = vrot.lane.b32.xlu0 %v5887_v31, %s5202_s30  ;;  %v6012_v31 = vld [vmem:[#allocation3 + $0x58] sm:$0xff] }
 0x372   : > { %2727 = vperm.xlu1 %4845, %v5992_v18   ;;  %v1551_v30 = vpop.permute.xlu0 %1550 }
 0x393   : > { %v2620_v40 = vpop.xlane.xlu1 %2619 }
 0x394   : > { %v6004_v29 = vmax.f32 %v6001_v27, %v2620_v40 }
 0x396   : > { %v2648_v45 = vsub.f32 %v6001_v27, %v6004_v29  ;;  %3538 = vst.msk [vmem:[#allocation3 + $0x48] sm:$0xff] %vm913_vm4, %v6004_v29  ;;  %2722 = vperm.xlu0 %4844, %v6004_v29  }
 0x397   : > { %v1549_v4 = vpop.permute.xlu1 %1548 }
 0x398   : > { %v2669_v54 = vmul.f32 1.442695, %v2648_v45 }
 0x39a   : > { %1570 = vrot.lane.b32.xlu0 %v1547_v1, %s5202_s30 }
 0x3a3   : > { %v2626_v32 = vpop.xlane.xlu0 %2625 }
 0x3a4   : > { %v6015_v44 = vmax.f32 %v6012_v31, %v2626_v32 }
 0x3a6   : > { %v2650_v25 = vsub.f32 %v6012_v31, %v6015_v44  ;;  %3540 = vst.msk [vmem:[#allocation3 + $0x58] sm:$0xff] %vm913_vm4, %v6015_v44  ;;  %2732 = vperm.xlu0 %4844, %v6015_v44  }
 0x3bd   : > { %v2678_v2 = vpop.permute.xlu0 %2677 }
 0x3be   : > { %v2735_v51 = vsub.f32 %v5822_v15, %v2678_v2 }
 0x3c0   : > { %v2747_v61 = vmul.f32 1.442695, %v2735_v51 }
 0x3c1   : > { %v1555_v6 = vpop.permute.xlu0 %1554 }
 0x3c2   : > { %4876 = vpow2.f32 %v2747_v61  ;;  %v1600_v33 = vcombine.low %v1551_v30, %v1555_v6  ;;  %v1601_v24 = vcombine.high %v1551_v30, %v1555_v6 }
 0x3c4   : > { %v1608_v39 = vrot.slane %v1600_v33, %v5519_v42  ;;  %v1615_v34 = vrot.slane %v1601_v24, %v5519_v42 }
 0x3c5   : > { %v2683_v3 = vpop.permute.xlu1 %2682 }
 0x3c6   : > { %v2736_v20 = vsub.f32 %v5832_v21, %v2683_v3 }
 0x3c8   : > { %v2749_v2 = vmul.f32 1.442695, %v2736_v20 }
 0x3c9   : > { %v1553_v1 = vpop.permute.xlu1 %1552 }
 0x3ca   : > { %v1584_v40 = vcombine.low %v1549_v4, %v1553_v1  ;;  %v1585_v32 = vcombine.high %v1549_v4, %v1553_v1  ;;  %4878 = vpow2.f32 %v2749_v2 }
 0x3cc   : > { %v1592_v14 = vrot.slane %v1584_v40, %v5519_v42  ;;  %v1599_v15 = vrot.slane %v1585_v32, %v5519_v42 }
 0x3cd   : > { %v2688_v51 = vpop.permute.xlu1 %2687  ;;  %v2693_v61 = vpop.permute.xlu0 %2692 }
 0x3ce   : > { %v1648_v7 = vcombine.low %v1592_v14, %v1608_v39  ;;  %v1649_v50 = vcombine.high %v1592_v14, %v1608_v39  ;;  %v1664_v60 = vcombine.low %v1599_v15, %v1615_v34  ;;  %v1665_v30 = vcombine.high %v1599_v15, %v1615_v34 }
 0x3cf   : > { %v6028_v6 = vpop.eup %4876  ;;  %v2737_v21 = vsub.f32 %v5825_v17, %v2688_v51  ;;  %v2738_v4 = vsub.f32 %v5837_v28, %v2693_v61 }
 0x3d0   : > { %v1656_v3 = vrot.slane %v1648_v7, %v5526_v49  ;;  %v1663_v33 = vrot.slane %v1649_v50, %v5526_v49  ;;  %v1672_v24 = vrot.slane %v1664_v60, %v5526_v49  ;;  %v1679_v20 = vrot.slane %v1665_v30, %v5526_v49 }
 0x3d1   : > { %v2751_v1 = vmul.f32 1.442695, %v2737_v21  ;;  %v2753_v40 = vmul.f32 1.442695, %v2738_v4  ;;  %v1557_v14 = vpop.permute.xlu1 %1556  ;;  %v2795_v34 = vsel %vm938_vm2, %v6028_v6, 0.0  ;;  %v1559_v39 = vpop.permute.xlu0 %1558 }
 0x3d2   : > { %v4428_v32 = vcombine.low %v1656_v3, %v1663_v33  ;;  %v4430_v17 = vcombine.high %v1656_v3, %v1663_v33  ;;  %v4432_v15 = vcombine.low %v1672_v24, %v1679_v20  ;;  %v4434_v28 = vcombine.high %v1672_v24, %v1679_v20  ;;  %2796 = vadd.xlane.f32.xlu1 %v2795_v34 }
 0x3d3   : > { %4880 = vpow2.f32 %v2751_v1 }
 0x3d4   : > { %v1796_v50 = vrot.slane %v4428_v32, %v5519_v42  ;;  %v1812_v60 = vrot.slane %v4430_v17, %v5519_v42  ;;  %v1828_v7 = vrot.slane %v4432_v15, %v5519_v42  ;;  %v1844_v2 = vrot.slane %v4434_v28, %v5519_v42 }
 0x3d5   : > { %4882 = vpow2.f32 %v2753_v40  ;;  %v2698_v51 = vpop.permute.xlu1 %2697 }
 0x3d6   : > { %v2739_v61 = vsub.f32 %v5842_v41, %v2698_v51  ;;  %v2703_v30 = vpop.permute.xlu0 %2702  ;;  %v1852_v21 = vcombine.low %v1796_v50, %v1812_v60  ;;  %v1884_v4 = vcombine.low %v1828_v7, %v1844_v2  ;;  %v1853_v3 = vcombine.high %v1796_v50, %v1812_v60 }
 0x3d7   : > { %v2740_v33 = vsub.f32 %v5847_v52, %v2703_v30  ;;  %v1885_v24 = vcombine.high %v1828_v7, %v1844_v2 }
 0x3d8   : > { %v2755_v20 = vmul.f32 1.442695, %v2739_v61  ;;  %v1860_v1 = vrot.slane %v1852_v21, %v5526_v49  ;;  %v1892_v34 = vrot.slane %v1884_v4, %v5526_v49  ;;  %v1867_v40 = vrot.slane %v1853_v3, %v5526_v49 }
 0x3d9   : > { %v2757_v32 = vmul.f32 1.442695, %v2740_v33  ;;  %v1561_v17 = vpop.permute.xlu1 %1560  ;;  %v1899_v15 = vrot.slane %v1885_v24, %v5526_v49 }
 0x3da   : > { %4884 = vpow2.f32 %v2755_v20  ;;  %v1616_v41 = vcombine.low %v1557_v14, %v1561_v17  ;;  %v1617_v28 = vcombine.high %v1557_v14, %v1561_v17  ;;  %v1563_v51 = vpop.permute.xlu0 %1562  ;;  %v1916_v50 = vcombine.low %v1860_v1, %v1892_v34  ;;  %v4879_v14 = vpop.eup %4878 }
 0x3db   : > { %4886 = vpow2.f32 %v2757_v32  ;;  %v1632_v52 = vcombine.low %v1559_v39, %v1563_v51  ;;  %v1633_v60 = vcombine.high %v1559_v39, %v1563_v51  ;;  %v1917_v7 = vcombine.high %v1860_v1, %v1892_v34 }
 0x3dc   : > { %v1624_v2 = vrot.slane %v1616_v41, %v5519_v42  ;;  %v1631_v61 = vrot.slane %v1617_v28, %v5519_v42  ;;  %v1992_v30 = vpack.c.bf16 %v1916_v50, %v1916_v50  ;;  %v1918_v21 = vcombine.low %v1867_v40, %v1899_v15 }
 0x3dd   : > { %v1640_v4 = vrot.slane %v1632_v52, %v5519_v42  ;;  %v1647_v3 = vrot.slane %v1633_v60, %v5519_v42  ;;  %v2708_v33 = vpop.permute.xlu1 %2707  ;;  %v1993_v24 = vpack.c.bf16 %v1917_v7, %v1917_v7  ;;  %v1919_v20 = vcombine.high %v1867_v40, %v1899_v15 }
 0x3de   : > { %v2741_v17 = vsub.f32 %v5852_v59, %v2708_v33  ;;  %v2957_v32 = vsel %vm2955_vm6, %v1992_v30, 0  ;;  %v1994_v39 = vpack.c.bf16 %v1918_v21, %v1918_v21  ;;  %v2940_v60 = vpack.c.bf16 %v6028_v6, %v6028_v6 }
 0x3df   : > { %v1680_v1 = vcombine.low %v1624_v2, %v1640_v4  ;;  %v1681_v34 = vcombine.high %v1624_v2, %v1640_v4  ;;  %v1696_v41 = vcombine.low %v1631_v61, %v1647_v3  ;;  %v1697_v51 = vcombine.high %v1631_v61, %v1647_v3  ;;  %4634 = vmatpush3.bf16.msra.mxu0 %v2957_v32 }
 0x3e0   : > { %v4881_v28 = vpop.eup %4880  ;;  %v2759_v50 = vmul.f32 1.442695, %v2741_v17  ;;  %v3003_v52 = vsel %vm2955_vm6, %v1993_v24, 0  ;;  %4645 = vmatprep.subr.bf16.mxu0 %v5185_v0  ;;  %v1995_v40 = vpack.c.bf16 %v1919_v20, %v1919_v20  ;;  %v2941_v6 = vpack.c.bf16 %v4879_v14, %v4879_v14 }
 0x3e1   : > { %v1688_v59 = vrot.slane %v1680_v1, %v5526_v49  ;;  %v1695_v15 = vrot.slane %v1681_v34, %v5526_v49  ;;  %v1704_v7 = vrot.slane %v1696_v41, %v5526_v49  ;;  %v1711_v2 = vrot.slane %v1697_v51, %v5526_v49  ;;  %4640 = vmatpush3.bf16.msra.mxu1 %v3003_v52  ;;  %v6062_v61 = vpop.permute.xlu1 %1564 }
 0x3e2   : > { %v4883_v30 = vpop.eup %4882  ;;  %4888 = vpow2.f32 %v2759_v50  ;;  %v2801_v21 = vsel %vm938_vm2, %v4881_v28, 0.0  ;;  %4636 = vmatmul.mubr.msk.bf16.vlgmr.msra.gmra.mxu0 %vm938_vm2, %v2940_v60  ;;  %4651 = vmatprep.subr.bf16.mxu1 %v5185_v0  ;;  %v3049_v4 = vsel %vm2955_vm6, %v1994_v39, 0  ;;  %v3095_v32 = vsel %vm2955_vm6, %v1995_v40, 0 }
 0x3e3   : > { %v4429_v3 = vcombine.low %v1688_v59, %v1695_v15  ;;  %v4431_v33 = vcombine.high %v1688_v59, %v1695_v15  ;;  %v4433_v24 = vcombine.low %v1704_v7, %v1711_v2  ;;  %v4435_v20 = vcombine.high %v1704_v7, %v1711_v2  ;;  %2802 = vadd.xlane.f32.xlu0 %v2801_v21 }
 0x3e4   : > { %v2804_v17 = vsel %vm938_vm2, %v4883_v30, 0.0  ;;  %4642 = vmatmul.mubr.msk.bf16.vlgmr.msra.gmra.mxu1 %vm938_vm2, %v2941_v6  ;;  %4646 = vmatpush3.bf16.msra.mxu0 %v3049_v4  ;;  %v2798_v52 = vsel %vm938_vm2, %v4879_v14, 0.0  ;;  %v2942_v4 = vpack.c.bf16 %v4881_v28, %v4881_v28  ;;  %v2943_v28 = vpack.c.bf16 %v4883_v30, %v4883_v30 }
 0x3e5   : > { %v1803_v1 = vrot.slane %v4429_v3, %v5519_v42  ;;  %v1819_v34 = vrot.slane %v4431_v33, %v5519_v42  ;;  %v1835_v41 = vrot.slane %v4433_v24, %v5519_v42  ;;  %v1851_v39 = vrot.slane %v4435_v20, %v5519_v42  ;;  %2805 = vadd.xlane.f32.xlu1 %v2804_v17  ;;  %v2718_v51 = vpop.permute.xlu1 %2717 }
 0x3e6   : > { %4652 = vmatpush3.bf16.msra.mxu1 %v3095_v32  ;;  %v2743_v50 = vsub.f32 %v5857_v8, %v2718_v51  ;;  %4647 = vmatprep.mubr.msk.bf16.mxu0 %vm5186_vm0, %v5185_v0 }
 0x3e7   : > { %v4885_v60 = vpop.eup %4884  ;;  %2799 = vadd.xlane.f32.xlu0 %v2798_v52  ;;  %4653 = vmatprep.mubr.msk.bf16.mxu1 %vm5186_vm0, %v5185_v0  ;;  %v1868_v40 = vcombine.low %v1803_v1, %v1819_v34  ;;  %v1900_v59 = vcombine.low %v1835_v41, %v1851_v39  ;;  %v1869_v15 = vcombine.high %v1803_v1, %v1819_v34 }
 0x3e8   : > { %v4887_v7 = vpop.eup %4886  ;;  %v2713_v2 = vpop.permute.xlu0 %2712  ;;  %v2763_v21 = vmul.f32 1.442695, %v2743_v50  ;;  %v2807_v6 = vsel %vm938_vm2, %v4885_v60, 0.0  ;;  %4657 = vmatprep.subr.bf16.mxu0 %v5185_v0  ;;  %4663 = vmatprep.subr.bf16.mxu1 %v5185_v0  ;;  %v1901_v8 = vcombine.high %v1835_v41, %v1851_v39 }
 0x3e9   : > { %v2742_v14 = vsub.f32 %v5860_v11, %v2713_v2  ;;  %v6085_v3 = vpop.permute.xlu1 %1568  ;;  %v2810_v33 = vsel %vm938_vm2, %v4887_v7, 0.0  ;;  %v1876_v24 = vrot.slane %v1868_v40, %v5526_v49  ;;  %v1908_v20 = vrot.slane %v1900_v59, %v5526_v49 }
 0x3ea   : > { %4890 = vpow2.f32 %v2763_v21  ;;  %2811 = vadd.xlane.f32.xlu1 %v2810_v33  ;;  %4648 = vmatmul.mubr.msk.bf16.vlgmr.msra.gmra.mxu0 %vm938_vm2, %v2942_v4  ;;  %v1883_v11 = vrot.slane %v1869_v15, %v5526_v49  ;;  %v1915_v34 = vrot.slane %v1901_v8, %v5526_v49  ;;  %v2944_v8 = vpack.c.bf16 %v4885_v60, %v4885_v60 }
 0x3eb   : > { %v2761_v17 = vmul.f32 1.442695, %v2742_v14  ;;  %2808 = vadd.xlane.f32.xlu0 %v2807_v6  ;;  %v1920_v32 = vcombine.low %v1876_v24, %v1908_v20  ;;  %v1921_v1 = vcombine.high %v1876_v24, %v1908_v20  ;;  %4659 = vmatprep.mubr.msk.bf16.mxu0 %vm5186_vm0, %v5185_v0  ;;  %v1720_v56 = vcombine.low %v6062_v61, %v6085_v3 }
 0x3ec   : > { %4654 = vmatmul.mubr.msk.bf16.vlgmr.msra.gmra.mxu1 %vm938_vm2, %v2943_v28  ;;  %v1922_v50 = vcombine.low %v1883_v11, %v1915_v34  ;;  %v1923_v52 = vcombine.high %v1883_v11, %v1915_v34  ;;  %v2651_v11 = vmul.f32 1.442695, %v2639_v53  ;;  %v2657_v34 = vmul.f32 1.442695, %v2642_v62 }
 0x3ed   : > { %4892 = vpow2.f32 %v2761_v17  ;;  %v2728_v41 = vpop.permute.xlu1 %2727  ;;  %v1996_v39 = vpack.c.bf16 %v1920_v32, %v1920_v32  ;;  %v1997_v51 = vpack.c.bf16 %v1921_v1, %v1921_v1  ;;  %4665 = vmatprep.mubr.msk.bf16.mxu1 %vm5186_vm0, %v5185_v0  ;;  %v1721_v53 = vcombine.high %v6062_v61, %v6085_v3 }
 0x3ee   : > { %v2745_v30 = vsub.f32 %v5867_v23, %v2728_v41  ;;  %v1998_v6 = vpack.c.bf16 %v1922_v50, %v1922_v50  ;;  %v1999_v4 = vpack.c.bf16 %v1923_v52, %v1923_v52  ;;  %v2945_v23 = vpack.c.bf16 %v4887_v7, %v4887_v7 }
 0x3ef   : > { %v4889_v40 = vpop.eup %4888  ;;  %v3141_v59 = vsel %vm2955_vm6, %v1996_v39, 0  ;;  %v3187_v15 = vsel %vm2955_vm6, %v1997_v51, 0  ;;  %v2661_v41 = vmul.f32 1.442695, %v2644_v10  ;;  %v1567_v39 = vpop.permute.xlu0 %1566  ;;  %v2665_v51 = vmul.f32 1.442695, %v2646_v19 }
 0x3f0   : > { %v2767_v2 = vmul.f32 1.442695, %v2745_v30  ;;  %4658 = vmatpush3.bf16.msra.mxu0 %v3141_v59  ;;  %4664 = vmatpush3.bf16.msra.mxu1 %v3187_v15  ;;  %v2813_v21 = vsel %vm938_vm2, %v4889_v40, 0.0  ;;  %v3233_v14 = vsel %vm2955_vm6, %v1998_v6, 0  ;;  %v3279_v33 = vsel %vm2955_vm6, %v1999_v4, 0 }
 0x3f1   : > { %2814 = vadd.xlane.f32.xlu0 %v2813_v21  ;;  %4669 = vmatprep.subr.bf16.mxu0 %v5185_v0  ;;  %v2946_v24 = vpack.c.bf16 %v4889_v40, %v4889_v40  ;;  %v1735_v16 = vrot.slane %v1721_v53, %v5519_v42  ;;  %v2673_v50 = vmul.f32 1.442695, %v2650_v25 }
 0x3f2   : > { %4894 = vpow2.f32 %v2767_v2  ;;  %4675 = vmatprep.subr.bf16.mxu1 %v5185_v0 }
 0x3f3   : > { %4660 = vmatmul.mubr.msk.bf16.vlgmr.msra.gmra.mxu0 %vm938_vm2, %v2944_v8  ;;  %4896 = vpow2.f32 %v2651_v11 }
 0x3f4   : > { %4666 = vmatmul.mubr.msk.bf16.vlgmr.msra.gmra.mxu1 %vm938_vm2, %v2945_v23  ;;  %4670 = vmatpush3.bf16.msra.mxu0 %v3233_v14  ;;  %4898 = vpow2.f32 %v2657_v34 }
 0x3f5   : > { %4676 = vmatpush3.bf16.msra.mxu1 %v3279_v33  ;;  %4671 = vmatprep.mubr.msk.bf16.mxu0 %vm5186_vm0, %v5185_v0  ;;  %4900 = vpow2.f32 %v2661_v41 }
 0x3f6   : > { %4677 = vmatprep.mubr.msk.bf16.mxu1 %vm5186_vm0, %v5185_v0  ;;  %4681 = vmatprep.subr.bf16.mxu0 %v5185_v0  ;;  %4902 = vpow2.f32 %v2665_v51 }
 0x3f7   : > { %v6113_v60 = vpop.eup %4890  ;;  %4687 = vmatprep.subr.bf16.mxu1 %v5185_v0 }
 0x3f8   : > { %v2819_v7 = vsel %vm938_vm2, %v6113_v60, 0.0 }
 0x3f9   : > { %2820 = vadd.xlane.f32.xlu0 %v2819_v7 }
 0x3fa   : > { %v4893_v20 = vpop.eup %4892 }
 0x3fb   : > { %v2816_v28 = vsel %vm938_vm2, %v4893_v20, 0.0  ;;  %4672 = vmatmul.mubr.msk.bf16.vlgmr.msra.gmra.mxu0 %vm938_vm2, %v2946_v24  ;;  %v2947_v17 = vpack.c.bf16 %v4893_v20, %v4893_v20 }
 0x3fc   : > { %2817 = vadd.xlane.f32.xlu1 %v2816_v28  ;;  %4683 = vmatprep.mubr.msk.bf16.mxu0 %vm5186_vm0, %v5185_v0 }
 0x3fd   : > { %4678 = vmatmul.mubr.msk.bf16.vlgmr.msra.gmra.mxu1 %vm938_vm2, %v2947_v17 }
 0x3fe   : > { %4689 = vmatprep.mubr.msk.bf16.mxu1 %vm5186_vm0, %v5185_v0 }
 0x3ff   : > { %v6125_v32 = vpop.eup %4894 }
 0x400   : > { %v2825_v1 = vsel %vm938_vm2, %v6125_v32, 0.0  ;;  %v6149_v55 = vpop.eup %4896 }
 0x401   : > { %2826 = vadd.xlane.f32.xlu0 %v2825_v1  ;;  %v6156_v61 = vpop.eup %4898 }
 0x402   : > { %v6166_v2 = vpop.eup %4900 }
 0x403   : > { %v6173_v33 = vpop.eup %4902 }
 0x411   : > { %v2723_v30 = vpop.permute.xlu0 %2722 }
 0x412   : > { %v2744_v43 = vsub.f32 %v5876_v22, %v2723_v30  ;;  %v1728_v22 = vrot.slane %v1720_v56, %v5519_v42 }
 0x414   : > { %v2765_v35 = vmul.f32 1.442695, %v2744_v43 }
 0x415   : > { %v1571_v62 = vpop.permute.xlu0 %1570 }
 0x416   : > { %4904 = vpow2.f32 %v2765_v35  ;;  %v1736_v9 = vcombine.low %v1567_v39, %v1571_v62  ;;  %v1737_v10 = vcombine.high %v1567_v39, %v1571_v62 }
 0x417   : > { %2870 = vperm.xlu0 %4844, %v6149_v55   ;;  %4906 = vpow2.f32 %v2669_v54 }
 0x418   : > { %v1744_v38 = vrot.slane %v1736_v9, %v5519_v42  ;;  %v1751_v19 = vrot.slane %v1737_v10, %v5519_v42  ;;  %4908 = vpow2.f32 %v2673_v50 }
 0x41a   : > { %v1752_v27 = vcombine.low %v1728_v22, %v1744_v38  ;;  %v1753_v29 = vcombine.high %v1728_v22, %v1744_v38  ;;  %v1768_v45 = vcombine.low %v1735_v16, %v1751_v19  ;;  %v1769_v3 = vcombine.high %v1735_v16, %v1751_v19 }
 0x41b   : > { %2885 = vperm.xlu0 %4844, %v6156_v61   ;;  %v2948_v19 = vpack.c.bf16 %v6113_v60, %v6113_v60 }
 0x41c   : > { %v1760_v52 = vrot.slane %v1752_v27, %v5526_v49  ;;  %v1767_v40 = vrot.slane %v1753_v29, %v5526_v49  ;;  %v1776_v59 = vrot.slane %v1768_v45, %v5526_v49  ;;  %v1783_v15 = vrot.slane %v1769_v3, %v5526_v49 }
 0x41d   : > { %v6417_v3 = vsub.f32 %v5904_v48, %v5913_v58  ;;  %v6419_v48 = vsub.f32 %v5933_v63, %v5940_v5 }
 0x41e   : > { %v1924_v21 = vcombine.low %v1760_v52, %v1767_v40  ;;  %v4436_v6 = vcombine.high %v1760_v52, %v1767_v40  ;;  %v1940_v4 = vcombine.low %v1776_v59, %v1783_v15  ;;  %v4437_v8 = vcombine.high %v1776_v59, %v1783_v15 }
 0x41f   : > { %2895 = vperm.xlu0 %4844, %v6166_v2   ;;  %v2653_v50 = vmul.f32 1.442695, %v6417_v3  ;;  %v2950_v40 = vpack.c.bf16 %v6125_v32, %v6125_v32  ;;  %v6418_v15 = vsub.f32 %v5894_v46, %v5902_v47  ;;  %v2659_v58 = vmul.f32 1.442695, %v6419_v48 }
 0x420   : > { %v1931_v31 = vrot.slane %v1924_v21, %v5519_v42  ;;  %v1939_v44 = vrot.slane %v4436_v6, %v5519_v42  ;;  %v1947_v25 = vrot.slane %v1940_v4, %v5519_v42  ;;  %v1955_v23 = vrot.slane %v4437_v8, %v5519_v42 }
 0x421   : > { %v2733_v14 = vpop.permute.xlu0 %2732  ;;  %v2655_v21 = vmul.f32 1.442695, %v6418_v15  ;;  %v6420_v32 = vsub.f32 %v5955_v12, %v5959_v13  ;;  %v6421_v4 = vsub.f32 %v5967_v57, %v5971_v36  ;;  %v6422_v46 = vsub.f32 %v5983_v37, %v5992_v18  ;;  %v2771_v13 = vld [vmem:[#allocation4] sm:$0xff]  ;;  %v2773_v18 = vld [vmem:[#allocation4 + $0x10] sm:$0xff] }
 0x422   : > { %v2746_v7 = vsub.f32 %v5881_v26, %v2733_v14  ;;  %v1956_v24 = vcombine.low %v1931_v31, %v1939_v44  ;;  %v1972_v20 = vcombine.low %v1947_v25, %v1955_v23  ;;  %v1957_v28 = vcombine.high %v1931_v31, %v1939_v44  ;;  %v2774_v14 = vld [vmem:[#allocation4 + $0x18] sm:$0xff] }
 0x423   : > { %v4905_v17 = vpop.eup %4904  ;;  %2905 = vperm.xlu0 %4844, %v6173_v33   ;;  %v1973_v1 = vcombine.high %v1947_v25, %v1955_v23  ;;  %v2663_v6 = vmul.f32 1.442695, %v6420_v32  ;;  %v2667_v8 = vmul.f32 1.442695, %v6421_v4  ;;  %v2671_v47 = vmul.f32 1.442695, %v6422_v46 }
 0x424   : > { %v2769_v11 = vmul.f32 1.442695, %v2746_v7  ;;  %v2822_v34 = vsel %vm938_vm2, %v4905_v17, 0.0  ;;  %v1964_v41 = vrot.slane %v1956_v24, %v5526_v49  ;;  %v1980_v39 = vrot.slane %v1972_v20, %v5526_v49  ;;  %v6182_v26 = vpop.eup %4906  ;;  %v2772_v20 = vld [vmem:[#allocation4 + $0x8] sm:$0xff] }
 0x425   : > { %2823 = vadd.xlane.f32.xlu1 %v2822_v34  ;;  %v1971_v51 = vrot.slane %v1957_v28, %v5526_v49  ;;  %v1987_v30 = vrot.slane %v1973_v1, %v5526_v49  ;;  %v6187_v38 = vpop.eup %4908  ;;  %v2949_v27 = vpack.c.bf16 %v4905_v17, %v4905_v17  ;;  %v2783_v57 = vmul.f32 %v6149_v55, %v2771_v13  ;;  %v2776_v55 = vld [vmem:[#allocation4 + $0x28] sm:$0xff] }
 0x426   : > { %4910 = vpow2.f32 %v2769_v11  ;;  %v1988_v43 = vcombine.low %v1964_v41, %v1980_v39  ;;  %v1989_v56 = vcombine.high %v1964_v41, %v1980_v39  ;;  %v2786_v28 = vmul.f32 %v6156_v61, %v2774_v14  ;;  %v2775_v39 = vld [vmem:[#allocation4 + $0x20] sm:$0xff] }
 0x427   : > { %2915 = vperm.xlu0 %4844, %v6182_v26   ;;  %v1990_v53 = vcombine.low %v1971_v51, %v1987_v30  ;;  %v1991_v35 = vcombine.high %v1971_v51, %v1987_v30  ;;  %4912 = vpow2.f32 %v2653_v50  ;;  %v2788_v30 = vmul.f32 %v6166_v2, %v2776_v55 }
 0x428   : > { %v2000_v54 = vpack.c.bf16 %v1988_v43, %v1988_v43  ;;  %v2001_v62 = vpack.c.bf16 %v1989_v56, %v1989_v56  ;;  %4914 = vpow2.f32 %v2655_v21 }
 0x429   : > { %v2002_v22 = vpack.c.bf16 %v1990_v53, %v1990_v53  ;;  %v2003_v16 = vpack.c.bf16 %v1991_v35, %v1991_v35  ;;  %4916 = vpow2.f32 %v2659_v58  ;;  %v2781_v58 = vld [vmem:[#allocation4 + $0x50] sm:$0xff] }
 0x42a   : > { %v3325_v9 = vsel %vm2955_vm6, %v2000_v54, 0  ;;  %v3371_v10 = vsel %vm2955_vm6, %v2001_v62, 0  ;;  %4918 = vpow2.f32 %v2663_v6  ;;  %v2777_v62 = vld [vmem:[#allocation4 + $0x30] sm:$0xff] }
 0x42b   : > { %4682 = vmatpush3.bf16.msra.mxu0 %v3325_v9  ;;  %4688 = vmatpush3.bf16.msra.mxu1 %v3371_v10  ;;  %v3417_v29 = vsel %vm2955_vm6, %v2002_v22, 0  ;;  %v3463_v45 = vsel %vm2955_vm6, %v2003_v16, 0  ;;  %4920 = vpow2.f32 %v2667_v8 }
 0x42c   : > { %4693 = vmatprep.subr.bf16.mxu0 %v5185_v0  ;;  %4699 = vmatprep.subr.bf16.mxu1 %v5185_v0  ;;  %4922 = vpow2.f32 %v2671_v47 }
 0x42d   : > { %2925 = vperm.xlu0 %4844, %v6187_v38  }
 0x42e   : > { %4684 = vmatmul.mubr.msk.bf16.vlgmr.msra.gmra.mxu0 %vm938_vm2, %v2948_v19  ;;  %4690 = vmatmul.mubr.msk.bf16.vlgmr.msra.gmra.mxu1 %vm938_vm2, %v2949_v27  ;;  %v2779_v27 = vld [vmem:[#allocation4 + $0x40] sm:$0xff] }
 0x42f   : > { %4694 = vmatpush3.bf16.msra.mxu0 %v3417_v29  ;;  %4700 = vmatpush3.bf16.msra.mxu1 %v3463_v45 }
 0x430   : > { %4695 = vmatprep.mubr.msk.bf16.mxu0 %vm5186_vm0, %v5185_v0  ;;  %4701 = vmatprep.mubr.msk.bf16.mxu1 %vm5186_vm0, %v5185_v0 }
 0x431   : > { %4705 = vmatprep.subr.bf16.mxu0 %v5185_v0 }
 0x433   : > { %v4911_v60 = vpop.eup %4910 }
 0x434   : > { %v2828_v52 = vsel %vm938_vm2, %v4911_v60, 0.0  ;;  %v2951_v59 = vpack.c.bf16 %v4911_v60, %v4911_v60  ;;  %v4913_v31 = vpop.eup %4912  ;;  %v2778_v60 = vld [vmem:[#allocation4 + $0x38] sm:$0xff] }
 0x435   : > { %2829 = vadd.xlane.f32.xlu1 %v2828_v52  ;;  %v4915_v44 = vpop.eup %4914  ;;  %v2784_v34 = vmul.f32 %v4913_v31, %v2772_v20 }
 0x436   : > { %4696 = vmatmul.mubr.msk.bf16.vlgmr.msra.gmra.mxu0 %vm938_vm2, %v2950_v40  ;;  %4702 = vmatmul.mubr.msk.bf16.vlgmr.msra.gmra.mxu1 %vm938_vm2, %v2951_v59  ;;  %v4917_v63 = vpop.eup %4916  ;;  %v2785_v7 = vmul.f32 %v4915_v44, %v2773_v18  ;;  %v2790_v59 = vmul.f32 %v6173_v33, %v2778_v60 }
 0x437   : > { %4717 = vmatprep.mubr.msk.bf16.mxu0 %vm5186_vm0, %v5185_v0  ;;  %v4919_v5 = vpop.eup %4918  ;;  %v2787_v53 = vmul.f32 %v4917_v63, %v2775_v39  ;;  %vm4124_vm0 = vcmask 719872  }
 0x438   : > { %v4921_v12 = vpop.eup %4920  ;;  %v2789_v10 = vmul.f32 %v4919_v5, %v2777_v62  ;;  %v2861_v62 = vld [vmem:[#allocation5 + $0x28] sm:$0xff] }
 0x439   : > { %v6228_v25 = vpop.eup %4922  ;;  %v2791_v3 = vmul.f32 %v4921_v12, %v2779_v27 }
 0x43a   : > { %v2793_v6 = vmul.f32 %v6228_v25, %v2781_v58 }
 0x446   : > { %2875 = vperm.xlu1 %4845, %v4913_v31  }
 0x44a   : > { %2880 = vperm.xlu1 %4845, %v4915_v44  }
 0x44e   : > { %2890 = vperm.xlu1 %4845, %v4917_v63  }
 0x452   : > { %2900 = vperm.xlu1 %4845, %v4919_v5  }
 0x456   : > { %2910 = vperm.xlu1 %4845, %v4921_v12  }
 0x45a   : > { %2920 = vperm.xlu1 %4845, %v6228_v25   ;;  %v2856_v25 = vld [vmem:[#allocation5] sm:$0xff] }
 0x45b   : > { %v2797_v36 = vpop.xlane.xlu1 %2796 }
 0x45c   : > { %v2831_v23 = vadd.f32 %v2797_v36, %v2783_v57 }
 0x45e   : > { %2844 = vst.msk [vmem:[#allocation4] sm:$0xff] %vm913_vm4, %v2831_v23 }
 0x465   : > { %v3556_v37 = vld [vmem:[#allocation4] sm:$0xff] }
 0x466   : > { %4924 = vrcp.f32 %v3556_v37 }
 0x46c   : > { %v2803_v24 = vpop.xlane.xlu0 %2802 }
 0x46d   : > { %v2833_v17 = vadd.f32 %v2803_v24, %v2785_v7 }
 0x46e   : > { %v2806_v1 = vpop.xlane.xlu1 %2805 }
 0x46f   : > { %v2834_v11 = vadd.f32 %v2806_v1, %v2786_v28  ;;  %2846 = vst.msk [vmem:[#allocation4 + $0x10] sm:$0xff] %vm913_vm4, %v2833_v17  ;;  %v2859_v28 = vld [vmem:[#allocation5 + $0x18] sm:$0xff] }
 0x470   : > { %v2800_v41 = vpop.xlane.xlu0 %2799 }
 0x471   : > { %2847 = vst.msk [vmem:[#allocation4 + $0x18] sm:$0xff] %vm913_vm4, %v2834_v11  ;;  %v2832_v51 = vadd.f32 %v2800_v41, %v2784_v34  ;;  %v2780_v34 = vld [vmem:[#allocation4 + $0x48] sm:$0xff] }
 0x473   : > { %v4925_v43 = vpop.eup %4924  ;;  %2845 = vst.msk [vmem:[#allocation4 + $0x8] sm:$0xff] %vm913_vm4, %v2832_v51  ;;  %v2812_v56 = vpop.xlane.xlu1 %2811 }
 0x474   : > { %v2836_v61 = vadd.f32 %v2812_v56, %v2788_v30  ;;  %v2809_v35 = vpop.xlane.xlu0 %2808  ;;  %3582 = vperm.xlu1 %4845, %v4925_v43   ;;  %v2792_v30 = vmul.f32 %v6182_v26, %v2780_v34 }
 0x475   : > { %v2835_v54 = vadd.f32 %v2809_v35, %v2787_v53 }
 0x476   : > { %2849 = vst.msk [vmem:[#allocation4 + $0x28] sm:$0xff] %vm913_vm4, %v2836_v61  ;;  %v3558_v9 = vld [vmem:[#allocation4 + $0x10] sm:$0xff] }
 0x477   : > { %2848 = vst.msk [vmem:[#allocation4 + $0x20] sm:$0xff] %vm913_vm4, %v2835_v54  ;;  %4926 = vrcp.f32 %v3558_v9 }
 0x478   : > { %v3559_v19 = vld [vmem:[#allocation4 + $0x18] sm:$0xff] }
 0x47a   : > { %v2815_v22 = vpop.xlane.xlu0 %2814  ;;  %v3557_v16 = vld [vmem:[#allocation4 + $0x8] sm:$0xff] }
 0x47b   : > { %v2837_v2 = vadd.f32 %v2815_v22, %v2789_v10  ;;  %4928 = vrcp.f32 %v3557_v16 }
 0x47c   : > { %4930 = vrcp.f32 %v3559_v19 }
 0x47d   : > { %2850 = vst.msk [vmem:[#allocation4 + $0x30] sm:$0xff] %vm913_vm4, %v2837_v2  ;;  %v3561_v45 = vld [vmem:[#allocation4 + $0x28] sm:$0xff] }
 0x47e   : > { %v3560_v29 = vld [vmem:[#allocation4 + $0x20] sm:$0xff] }
 0x47f   : > { %4932 = vrcp.f32 %v3560_v29 }
 0x480   : > { %4934 = vrcp.f32 %v3561_v45 }
 0x482   : > { %v2821_v50 = vpop.xlane.xlu0 %2820 }
 0x483   : > { %v2839_v52 = vadd.f32 %v2821_v50, %v2791_v3 }
 0x484   : > { %v4927_v40 = vpop.eup %4926  ;;  %v3562_v15 = vld [vmem:[#allocation4 + $0x30] sm:$0xff] }
 0x485   : > { %v2818_v21 = vpop.xlane.xlu1 %2817  ;;  %2852 = vst.msk [vmem:[#allocation4 + $0x40] sm:$0xff] %vm913_vm4, %v2839_v52  ;;  %3592 = vperm.xlu1 %4845, %v4927_v40   ;;  %4936 = vrcp.f32 %v3562_v15  ;;  %v2863_v52 = vld [vmem:[#allocation5 + $0x38] sm:$0xff] }
 0x486   : > { %v2838_v48 = vadd.f32 %v2818_v21, %v2790_v59  ;;  %v2782_v15 = vld [vmem:[#allocation4 + $0x58] sm:$0xff] }
 0x488   : > { %v4929_v32 = vpop.eup %4928  ;;  %2851 = vst.msk [vmem:[#allocation4 + $0x38] sm:$0xff] %vm913_vm4, %v2838_v48 }
 0x489   : > { %3587 = vperm.xlu0 %4844, %v4929_v32   ;;  %v4931_v8 = vpop.eup %4930  ;;  %v2794_v32 = vmul.f32 %v6187_v38, %v2782_v15 }
 0x48a   : > { %v2827_v4 = vpop.xlane.xlu0 %2826 }
 0x48b   : > { %v2841_v31 = vadd.f32 %v2827_v4, %v2793_v6 }
 0x48c   : > { %v4933_v46 = vpop.eup %4932  ;;  %v3564_v47 = vld [vmem:[#allocation4 + $0x40] sm:$0xff] }
 0x48d   : > { %4938 = vrcp.f32 %v3564_v47  ;;  %2854 = vst.msk [vmem:[#allocation4 + $0x50] sm:$0xff] %vm913_vm4, %v2841_v31  ;;  %3597 = vperm.xlu0 %4844, %v4931_v8   ;;  %3602 = vperm.xlu1 %4845, %v4933_v46   ;;  %v4935_v44 = vpop.eup %4934 }
 0x48f   : > { %v3563_v33 = vld [vmem:[#allocation4 + $0x38] sm:$0xff] }
 0x490   : > { %4940 = vrcp.f32 %v3563_v33 }
 0x491   : > { %3607 = vperm.xlu0 %4844, %v4935_v44   ;;  %v2857_v44 = vld [vmem:[#allocation5 + $0x8] sm:$0xff] }
 0x492   : > { %v4937_v63 = vpop.eup %4936  ;;  %v2871_v57 = vpop.permute.xlu0 %2870 }
 0x493   : > { %3612 = vperm.xlu1 %4845, %v4937_v63   ;;  %v2928_v36 = vmul.f32 %v2871_v57, %v2856_v25  ;;  %v2858_v57 = vld [vmem:[#allocation5 + $0x10] sm:$0xff] }
 0x494   : > { %v3566_v5 = vld [vmem:[#allocation4 + $0x50] sm:$0xff] }
 0x495   : > { %4942 = vrcp.f32 %v3566_v5 }
 0x496   : > { %v2886_v17 = vpop.permute.xlu0 %2885 }
 0x497   : > { %v2931_v41 = vmul.f32 %v2886_v17, %v2859_v28  ;;  %v2862_v17 = vld [vmem:[#allocation5 + $0x30] sm:$0xff] }
 0x49a   : > { %v4939_v12 = vpop.eup %4938  ;;  %v2896_v9 = vpop.permute.xlu0 %2895 }
 0x49b   : > { %3622 = vperm.xlu1 %4845, %v4939_v12   ;;  %v2933_v2 = vmul.f32 %v2896_v9, %v2861_v62 }
 0x49d   : > { %v4941_v13 = vpop.eup %4940 }
 0x49e   : > { %3617 = vperm.xlu0 %4844, %v4941_v13   ;;  %v2906_v40 = vpop.permute.xlu0 %2905 }
 0x49f   : > { %v2935_v58 = vmul.f32 %v2906_v40, %v2863_v52 }
 0x4a2   : > { %v4943_v23 = vpop.eup %4942  ;;  %v2993_v37 = vpop.f32.mrf.mxu0 }
 0x4a3   : > { %v3505_v18 = vadd.f32 %v2993_v37, %v2928_v36  ;;  %3632 = vperm.xlu1 %4845, %v4943_v23  }
 0x4a4   : > { %v6246_v14 = vpop.f32.mrf.mxu1  ;;  %v4637_v7 = vpop.f32.mrf.mxu0 }
 0x4a5   : > { %3517 = vst.msk [vmem:[#allocation5] sm:$0xff] %vm938_vm2, %v3505_v18  ;;  %v2860_v7 = vld [vmem:[#allocation5 + $0x20] sm:$0xff] }
 0x4a6   : > { %v4643_v24 = vpop.f32.mrf.mxu1  ;;  %v2996_v20 = vpop.f32.mrf.mxu0 }
 0x4a8   : > { %v3042_v1 = vpop.f32.mrf.mxu1  ;;  %v4638_v11 = vpop.f32.mrf.mxu0 }
 0x4aa   : > { %v4644_v55 = vpop.f32.mrf.mxu1  ;;  %v3085_v39 = vpop.f32.mrf.mxu0 }
 0x4ac   : > { %v3131_v51 = vpop.f32.mrf.mxu1  ;;  %v4649_v56 = vpop.f32.mrf.mxu0 }
 0x4ad   : > { %v3508_v43 = vadd.f32 %v3131_v51, %v2931_v41  ;;  %v2865_v41 = vld [vmem:[#allocation5 + $0x48] sm:$0xff]  ;;  %v2916_v51 = vpop.permute.xlu0 %2915 }
 0x4ae   : > { %v2824_v53 = vpop.xlane.xlu1 %2823  ;;  %v4655_v61 = vpop.f32.mrf.mxu1 }
 0x4af   : > { %v2840_v35 = vadd.f32 %v2824_v53, %v2792_v30  ;;  %3520 = vst.msk [vmem:[#allocation5 + $0x18] sm:$0xff] %vm938_vm2, %v3508_v43  ;;  %v3088_v54 = vpop.f32.mrf.mxu0  ;;  %v2864_v30 = vld [vmem:[#allocation5 + $0x40] sm:$0xff] }
 0x4b0   : > { %v3134_v10 = vpop.f32.mrf.mxu1 }
 0x4b1   : > { %2853 = vst.msk [vmem:[#allocation4 + $0x48] sm:$0xff] %vm913_vm4, %v2840_v35  ;;  %v4650_v22 = vpop.f32.mrf.mxu0  ;;  %v2926_v10 = vpop.permute.xlu0 %2925 }
 0x4b2   : > { %v4656_v16 = vpop.f32.mrf.mxu1 }
 0x4b3   : > { %v3177_v19 = vpop.f32.mrf.mxu0  ;;  %v2867_v16 = vld [vmem:[#allocation5 + $0x58] sm:$0xff] }
 0x4b4   : > { %v3223_v27 = vpop.f32.mrf.mxu1 }
 0x4b5   : > { %v3510_v29 = vadd.f32 %v3223_v27, %v2933_v2  ;;  %v4661_v26 = vpop.f32.mrf.mxu0  ;;  %v2866_v2 = vld [vmem:[#allocation5 + $0x50] sm:$0xff] }
 0x4b6   : > { %v4667_v45 = vpop.f32.mrf.mxu1 }
 0x4b7   : > { %3522 = vst.msk [vmem:[#allocation5 + $0x28] sm:$0xff] %vm938_vm2, %v3510_v29  ;;  %v3180_v60 = vpop.f32.mrf.mxu0  ;;  %v2939_v45 = vmul.f32 %v2926_v10, %v2867_v16 }
 0x4b8   : > { %v3565_v3 = vld [vmem:[#allocation4 + $0x48] sm:$0xff]  ;;  %v3226_v50 = vpop.f32.mrf.mxu1 }
 0x4b9   : > { %4944 = vrcp.f32 %v3565_v3  ;;  %v4662_v59 = vpop.f32.mrf.mxu0 }
 0x4ba   : > { %v4668_v21 = vpop.f32.mrf.mxu1 }
 0x4bb   : > { %v3269_v48 = vpop.f32.mrf.mxu0 }
 0x4bd   : > { %v3315_v6 = vpop.f32.mrf.mxu1  ;;  %v4673_v4 = vpop.f32.mrf.mxu0 }
 0x4be   : > { %v2830_v8 = vpop.xlane.xlu1 %2829  ;;  %v3512_v31 = vadd.f32 %v3315_v6, %v2935_v58 }
 0x4bf   : > { %v2842_v46 = vadd.f32 %v2830_v8, %v2794_v32  ;;  %v4679_v47 = vpop.f32.mrf.mxu1  ;;  %v3272_v33 = vpop.f32.mrf.mxu0 }
 0x4c0   : > { %3524 = vst.msk [vmem:[#allocation5 + $0x38] sm:$0xff] %vm938_vm2, %v3512_v31  ;;  %v3544_v47 = vld [vmem:[#allocation5] sm:$0xff] }
 0x4c1   : > { %2855 = vst.msk [vmem:[#allocation4 + $0x58] sm:$0xff] %vm913_vm4, %v2842_v46  ;;  %v3318_v63 = vpop.f32.mrf.mxu1  ;;  %v4674_v5 = vpop.f32.mrf.mxu0 }
 0x4c2   : > { %v2876_v12 = vpop.permute.xlu1 %2875  ;;  %v3547_v63 = vld [vmem:[#allocation5 + $0x18] sm:$0xff] }
 0x4c3   : > { %v2929_v13 = vmul.f32 %v2876_v12, %v2857_v44  ;;  %v4680_v25 = vpop.f32.mrf.mxu1 }
 0x4c5   : > { %v3506_v38 = vadd.f32 %v6246_v14, %v2929_v13 }
 0x4c6   : > { %v4945_v36 = vpop.eup %4944  ;;  %v2881_v23 = vpop.permute.xlu1 %2880 }
 0x4c7   : > { %3518 = vst.msk [vmem:[#allocation5 + $0x8] sm:$0xff] %vm938_vm2, %v3506_v38  ;;  %v2930_v37 = vmul.f32 %v2881_v23, %v2858_v57  ;;  %3627 = vperm.xlu0 %4844, %v4945_v36  }
 0x4c8   : > { %v3567_v18 = vld [vmem:[#allocation4 + $0x58] sm:$0xff] }
 0x4c9   : > { %4946 = vrcp.f32 %v3567_v18  ;;  %v3507_v24 = vadd.f32 %v3085_v39, %v2930_v37  ;;  %v2937_v39 = vmul.f32 %v2916_v51, %v2865_v41 }
 0x4ca   : > { %v2891_v20 = vpop.permute.xlu1 %2890 }
 0x4cb   : > { %3519 = vst.msk [vmem:[#allocation5 + $0x10] sm:$0xff] %vm938_vm2, %v3507_v24  ;;  %v2932_v28 = vmul.f32 %v2891_v20, %v2860_v7 }
 0x4cd   : > { %v3509_v1 = vadd.f32 %v3177_v19, %v2932_v28 }
 0x4ce   : > { %v2901_v11 = vpop.permute.xlu1 %2900  ;;  %v3545_v44 = vld [vmem:[#allocation5 + $0x8] sm:$0xff] }
 0x4cf   : > { %3521 = vst.msk [vmem:[#allocation5 + $0x20] sm:$0xff] %vm938_vm2, %v3509_v1  ;;  %v2934_v14 = vmul.f32 %v2901_v11, %v2862_v17 }
 0x4d1   : > { %v3511_v34 = vadd.f32 %v3269_v48, %v2934_v14 }
 0x4d2   : > { %v2911_v43 = vpop.permute.xlu1 %2910  ;;  %v3546_v8 = vld [vmem:[#allocation5 + $0x10] sm:$0xff] }
 0x4d3   : > { %3523 = vst.msk [vmem:[#allocation5 + $0x30] sm:$0xff] %vm938_vm2, %v3511_v34  ;;  %v2936_v56 = vmul.f32 %v2911_v43, %v2864_v30 }
 0x4d6   : > { %v4947_v55 = vpop.eup %4946  ;;  %v2921_v22 = vpop.permute.xlu1 %2920  ;;  %v3548_v10 = vld [vmem:[#allocation5 + $0x20] sm:$0xff] }
 0x4d7   : > { %3637 = vperm.xlu0 %4844, %v4947_v55   ;;  %v2938_v60 = vmul.f32 %v2921_v22, %v2866_v2 }
 0x4ee   : > { %v3361_v53 = vpop.f32.mrf.mxu0  ;;  %v3407_v61 = vpop.f32.mrf.mxu1 }
 0x4ef   : > { %v3513_v35 = vadd.f32 %v3361_v53, %v2936_v56  ;;  %v3514_v54 = vadd.f32 %v3407_v61, %v2937_v39  ;;  %v3583_v6 = vpop.permute.xlu1 %3582 }
 0x4f0   : > { %v4685_v62 = vpop.f32.mrf.mxu0  ;;  %v4691_v9 = vpop.f32.mrf.mxu1  ;;  %v3640_v33 = vmul.f32 %v3583_v6, %v3544_v47 }
 0x4f1   : > { %3525 = vst.msk [vmem:[#allocation5 + $0x40] sm:$0xff] %vm938_vm2, %v3513_v35  ;;  %3526 = vst.msk [vmem:[#allocation5 + $0x48] sm:$0xff] %vm938_vm2, %v3514_v54  ;;  %v3550_v62 = vld [vmem:[#allocation5 + $0x30] sm:$0xff] }
 0x4f2   : > { %v3364_v19 = vpop.f32.mrf.mxu0  ;;  %v3410_v27 = vpop.f32.mrf.mxu1 }
 0x4f3   : > { %v3549_v27 = vld [vmem:[#allocation5 + $0x28] sm:$0xff] }
 0x4f4   : > { %v4686_v29 = vpop.f32.mrf.mxu0  ;;  %v4692_v26 = vpop.f32.mrf.mxu1 }
 0x4f6   : > { %v3453_v3 = vpop.f32.mrf.mxu0  ;;  %v3499_v50 = vpop.f32.mrf.mxu1 }
 0x4f7   : > { %v3515_v52 = vadd.f32 %v3453_v3, %v2938_v60  ;;  %v3516_v40 = vadd.f32 %v3499_v50, %v2939_v45  ;;  %v3551_v45 = vld [vmem:[#allocation5 + $0x38] sm:$0xff] }
 0x4f8   : > { %v4697_v59 = vpop.f32.mrf.mxu0  ;;  %v4703_v15 = vpop.f32.mrf.mxu1 }
 0x4f9   : > { %3527 = vst.msk [vmem:[#allocation5 + $0x50] sm:$0xff] %vm938_vm2, %v3515_v52  ;;  %3528 = vst.msk [vmem:[#allocation5 + $0x58] sm:$0xff] %vm938_vm2, %v3516_v40 }
 0x4fa   : > { %v3456_v21 = vpop.f32.mrf.mxu0  ;;  %v3502_v48 = vpop.f32.mrf.mxu1 }
 0x4fc   : > { %v4698_v58 = vpop.f32.mrf.mxu0  ;;  %v4704_v32 = vpop.f32.mrf.mxu1 }
 0x500   : > { %v3593_v4 = vpop.permute.xlu1 %3592 }
 0x501   : > { %v3642_v46 = vmul.f32 %v3593_v4, %v3546_v8 }
 0x503   : > { %v3652_v12 = vcombine.low %v3640_v33, %v3642_v46  ;;  %v3653_v13 = vcombine.high %v3640_v33, %v3642_v46 }
 0x504   : > { %v3588_v31 = vpop.permute.xlu0 %3587 }
 0x505   : > { %v3641_v25 = vmul.f32 %v3588_v31, %v3545_v44  ;;  %v3660_v23 = vrot.slane %v3652_v12, %v5519_v42  ;;  %v3667_v37 = vrot.slane %v3653_v13, %v5519_v42 }
 0x508   : > { %v3598_v5 = vpop.permute.xlu0 %3597  ;;  %v3603_v24 = vpop.permute.xlu1 %3602 }
 0x509   : > { %v3643_v57 = vmul.f32 %v3598_v5, %v3547_v63  ;;  %v3644_v19 = vmul.f32 %v3603_v24, %v3548_v10  ;;  %v3554_v10 = vld [vmem:[#allocation5 + $0x50] sm:$0xff] }
 0x50b   : > { %v3668_v38 = vcombine.low %v3641_v25, %v3643_v57  ;;  %v3669_v36 = vcombine.high %v3641_v25, %v3643_v57 }
 0x50c   : > { %v3608_v54 = vpop.permute.xlu0 %3607 }
 0x50d   : > { %v3676_v18 = vrot.slane %v3668_v38, %v5519_v42  ;;  %v3683_v7 = vrot.slane %v3669_v36, %v5519_v42  ;;  %v3645_v26 = vmul.f32 %v3608_v54, %v3549_v27  ;;  %v3553_v27 = vld [vmem:[#allocation5 + $0x48] sm:$0xff] }
 0x50e   : > { %v3613_v39 = vpop.permute.xlu1 %3612 }
 0x50f   : > { %v3716_v20 = vcombine.low %v3660_v23, %v3676_v18  ;;  %v3717_v28 = vcombine.high %v3660_v23, %v3676_v18  ;;  %v3732_v17 = vcombine.low %v3667_v37, %v3683_v7  ;;  %v3733_v1 = vcombine.high %v3667_v37, %v3683_v7  ;;  %v4870_v7 = vld [vmem:[#allocation14 + $0x28] sm:$0xff]  }
 0x510   : > { %v3646_v9 = vmul.f32 %v3613_v39, %v3550_v62  ;;  %4706 = vmatpush3.bf16.msra.mxu0 %v4870_v7 }
 0x511   : > { %v3724_v11 = vrot.slane %v3716_v20, %v5526_v49  ;;  %v3731_v14 = vrot.slane %v3717_v28, %v5526_v49  ;;  %v3740_v34 = vrot.slane %v3732_v17, %v5526_v49  ;;  %v3747_v55 = vrot.slane %v3733_v1, %v5526_v49  ;;  %v4871_v1 = vld [vmem:[#allocation14 + $0x20] sm:$0xff]   ;;  %4707 = vmatprep.subr.bf16.mxu0 %v5185_v0 }
 0x512   : > { %v3684_v40 = vcombine.low %v3644_v19, %v3646_v9  ;;  %v3685_v59 = vcombine.high %v3644_v19, %v3646_v9 }
 0x513   : > { %v4462_v41 = vcombine.low %v3724_v11, %v3731_v14  ;;  %v4464_v51 = vcombine.high %v3724_v11, %v3731_v14  ;;  %v4466_v30 = vcombine.low %v3740_v34, %v3747_v55  ;;  %v4468_v43 = vcombine.high %v3740_v34, %v3747_v55 }
 0x514   : > { %v3692_v8 = vrot.slane %v3684_v40, %v5519_v42  ;;  %v3699_v31 = vrot.slane %v3685_v59, %v5519_v42  ;;  %4708 = vmatpush3.bf16.msra.mxu0 %v4871_v1 }
 0x515   : > { %v3864_v56 = vrot.slane %v4462_v41, %v5519_v42  ;;  %v3880_v53 = vrot.slane %v4464_v51, %v5519_v42  ;;  %v3896_v61 = vrot.slane %v4466_v30, %v5519_v42  ;;  %v3912_v35 = vrot.slane %v4468_v43, %v5519_v42  ;;  %v4872_v30 = vld [vmem:[#allocation14 + $0x18] sm:$0xff]   ;;  %4709 = vmatprep.subr.bf16.mxu0 %v5185_v0 }
 0x516   : > { %v3623_v62 = vpop.permute.xlu1 %3622 }
 0x517   : > { %v3921_v22 = vcombine.high %v3864_v56, %v3880_v53  ;;  %v3953_v16 = vcombine.high %v3896_v61, %v3912_v35  ;;  %v3920_v2 = vcombine.low %v3864_v56, %v3880_v53  ;;  %v3952_v29 = vcombine.low %v3896_v61, %v3912_v35  ;;  %v4873_v61 = vld [vmem:[#allocation14 + $0x10] sm:$0xff]  }
 0x518   : > { %4710 = vmatpush3.bf16.msra.mxu0 %v4872_v30 }
 0x519   : > { %v3618_v60 = vpop.permute.xlu0 %3617  ;;  %v3935_v3 = vrot.slane %v3921_v22, %v5526_v49  ;;  %v3967_v50 = vrot.slane %v3953_v16, %v5526_v49  ;;  %v6280_v52 = vrot.slane %v3920_v2, %v5526_v49  ;;  %v6283_v21 = vrot.slane %v3952_v29, %v5526_v49  ;;  %4711 = vmatprep.subr.bf16.mxu0 %v5185_v0  ;;  %v3552_v2 = vld [vmem:[#allocation5 + $0x40] sm:$0xff]  ;;  %v3555_v29 = vld [vmem:[#allocation5 + $0x58] sm:$0xff] }
 0x51a   : > { %v3647_v15 = vmul.f32 %v3618_v60, %v3551_v45  ;;  %v3648_v19 = vmul.f32 %v3623_v62, %v3552_v2 }
 0x51b   : > { %v3986_v48 = vcombine.low %v3935_v3, %v3967_v50  ;;  %v3985_v6 = vcombine.high %v6280_v52, %v6283_v21  ;;  %v3984_v4 = vcombine.low %v6280_v52, %v6283_v21  ;;  %v3987_v33 = vcombine.high %v3935_v3, %v3967_v50 }
 0x51c   : > { %v3700_v58 = vcombine.low %v3645_v26, %v3647_v15  ;;  %v3701_v32 = vcombine.high %v3645_v26, %v3647_v15  ;;  %4712 = vmatpush3.bf16.msra.mxu0 %v4873_v61 }
 0x51d   : > { %4065 = vrot.lane.b32.xlu0 %v3986_v48, %s5203_s8  ;;  %4061 = vrot.lane.b32.xlu1 %v3985_v6, %s5204_s28 }
 0x51e   : > { %v3708_v46 = vrot.slane %v3700_v58, %v5519_v42  ;;  %v3715_v47 = vrot.slane %v3701_v32, %v5519_v42  ;;  %4713 = vmatprep.subr.bf16.mxu0 %v5185_v0  ;;  %v3633_v9 = vpop.permute.xlu1 %3632 }
 0x51f   : > { %v3650_v16 = vmul.f32 %v3633_v9, %v3554_v10 }
 0x520   : > { %v3748_v44 = vcombine.low %v3692_v8, %v3708_v46  ;;  %v3749_v63 = vcombine.high %v3692_v8, %v3708_v46  ;;  %v3764_v5 = vcombine.low %v3699_v31, %v3715_v47  ;;  %v3765_v12 = vcombine.high %v3699_v31, %v3715_v47  ;;  %v4874_v47 = vld [vmem:[#allocation14 + $0x8] sm:$0xff]  }
 0x521   : > { %4069 = vrot.lane.b32.xlu1 %v3987_v33, %s5205_s9  ;;  %v3788_v45 = vcombine.low %v3648_v19, %v3650_v16  ;;  %v3789_v60 = vcombine.high %v3648_v19, %v3650_v16  ;;  %4714 = vmatpush3.bf16.msra.mxu0 %v4874_v47 }
 0x522   : > { %v3756_v13 = vrot.slane %v3748_v44, %v5526_v49  ;;  %v3763_v25 = vrot.slane %v3749_v63, %v5526_v49  ;;  %v3772_v57 = vrot.slane %v3764_v5, %v5526_v49  ;;  %v3779_v38 = vrot.slane %v3765_v12, %v5526_v49  ;;  %4715 = vmatprep.subr.bf16.mxu0 %v5185_v0 }
 0x523   : > { %v3796_v15 = vrot.slane %v3788_v45, %v5519_v42  ;;  %v3803_v48 = vrot.slane %v3789_v60, %v5519_v42 }
 0x524   : > { %v4463_v36 = vcombine.low %v3756_v13, %v3763_v25  ;;  %v4465_v23 = vcombine.high %v3756_v13, %v3763_v25  ;;  %v4467_v37 = vcombine.low %v3772_v57, %v3779_v38  ;;  %v4469_v18 = vcombine.high %v3772_v57, %v3779_v38  ;;  %v4875_v38 = vld [vmem:[#allocation14] sm:$0xff]  }
 0x525   : > { %4716 = vmatpush3.bf16.msra.mxu0 %v4875_v38 }
 0x526   : > { %v3871_v24 = vrot.slane %v4463_v36, %v5519_v42  ;;  %v3887_v20 = vrot.slane %v4465_v23, %v5519_v42  ;;  %v3903_v28 = vrot.slane %v4467_v37, %v5519_v42  ;;  %v3919_v17 = vrot.slane %v4469_v18, %v5519_v42 }
 0x528   : > { %v3936_v11 = vcombine.low %v3871_v24, %v3887_v20  ;;  %v3968_v14 = vcombine.low %v3903_v28, %v3919_v17  ;;  %v3937_v34 = vcombine.high %v3871_v24, %v3887_v20  ;;  %v3969_v55 = vcombine.high %v3903_v28, %v3919_v17 }
 0x52a   : > { %v3944_v41 = vrot.slane %v3936_v11, %v5526_v49  ;;  %v3976_v51 = vrot.slane %v3968_v14, %v5526_v49  ;;  %v3951_v56 = vrot.slane %v3937_v34, %v5526_v49  ;;  %v3983_v53 = vrot.slane %v3969_v55, %v5526_v49 }
 0x52c   : > { %v3989_v43 = vcombine.high %v3944_v41, %v3976_v51  ;;  %v3988_v39 = vcombine.low %v3944_v41, %v3976_v51  ;;  %v3991_v35 = vcombine.high %v3951_v56, %v3983_v53  ;;  %v3990_v54 = vcombine.low %v3951_v56, %v3983_v53 }
 0x52e   : > { %4077 = vrot.lane.b32.xlu1 %v3989_v43, %s5197_s29  ;;  %4073 = vrot.lane.b32.xlu0 %v3988_v39, %s5202_s30 }
 0x532   : > { %4085 = vrot.lane.b32.xlu1 %v3991_v35, %s5195_s17  ;;  %4081 = vrot.lane.b32.xlu0 %v3990_v54, %s5198_s25  ;;  %s5088_s17 = scalar_lea.vmem %s5087_s15, 256 }
 0x542   : > { %v3628_v22 = vpop.permute.xlu0 %3627 }
 0x543   : > { %v3649_v3 = vmul.f32 %v3628_v22, %v3553_v27 }
 0x552   : > { %v3638_v26 = vpop.permute.xlu0 %3637 }
 0x553   : > { %v3651_v50 = vmul.f32 %v3638_v26, %v3555_v29 }
 0x555   : > { %v3804_v40 = vcombine.low %v3649_v3, %v3651_v50  ;;  %v3805_v59 = vcombine.high %v3649_v3, %v3651_v50 }
 0x557   : > { %v3812_v58 = vrot.slane %v3804_v40, %v5519_v42  ;;  %v3819_v32 = vrot.slane %v3805_v59, %v5519_v42 }
 0x559   : > { %v3820_v6 = vcombine.low %v3796_v15, %v3812_v58  ;;  %v3821_v8 = vcombine.high %v3796_v15, %v3812_v58  ;;  %v3836_v31 = vcombine.low %v3803_v48, %v3819_v32  ;;  %v3837_v46 = vcombine.high %v3803_v48, %v3819_v32 }
 0x55b   : > { %v3828_v33 = vrot.slane %v3820_v6, %v5526_v49  ;;  %v3835_v44 = vrot.slane %v3821_v8, %v5526_v49  ;;  %v3844_v63 = vrot.slane %v3836_v31, %v5526_v49  ;;  %v3851_v5 = vrot.slane %v3837_v46, %v5526_v49 }
 0x55d   : > { %v3992_v12 = vcombine.low %v3828_v33, %v3835_v44  ;;  %v4470_v13 = vcombine.high %v3828_v33, %v3835_v44  ;;  %v4008_v25 = vcombine.low %v3844_v63, %v3851_v5  ;;  %v4471_v57 = vcombine.high %v3844_v63, %v3851_v5 }
 0x55f   : > { %v3999_v36 = vrot.slane %v3992_v12, %v5519_v42  ;;  %v4007_v23 = vrot.slane %v4470_v13, %v5519_v42  ;;  %v4015_v37 = vrot.slane %v4008_v25, %v5519_v42  ;;  %v4023_v18 = vrot.slane %v4471_v57, %v5519_v42 }
 0x561   : > { %v4024_v7 = vcombine.low %v3999_v36, %v4007_v23  ;;  %v4040_v24 = vcombine.low %v4015_v37, %v4023_v18  ;;  %v4025_v20 = vcombine.high %v3999_v36, %v4007_v23  ;;  %v4041_v28 = vcombine.high %v4015_v37, %v4023_v18 }
 0x563   : > { %v4032_v17 = vrot.slane %v4024_v7, %v5526_v49  ;;  %v4048_v1 = vrot.slane %v4040_v24, %v5526_v49  ;;  %v4039_v14 = vrot.slane %v4025_v20, %v5526_v49  ;;  %v4055_v34 = vrot.slane %v4041_v28, %v5526_v49 }
 0x565   : > { %v4057_v11 = vcombine.high %v4032_v17, %v4048_v1  ;;  %v4056_v0 = vcombine.low %v4032_v17, %v4048_v1  ;;  %v4059_v42 = vcombine.high %v4039_v14, %v4055_v34  ;;  %v4058_v55 = vcombine.low %v4039_v14, %v4055_v34 }
 0x567   : > { %4093 = vrot.lane.b32.xlu1 %v4057_v11, %s5193_s3  ;;  %4089 = vrot.lane.b32.xlu0 %v4056_v0, %s5196_s13  ;;  %s4221_s3 = scalar_lea.sflag [#allocation8], %s5388_s4 }
 0x56b   : > { %4101 = vrot.lane.b32.xlu1 %v4059_v42, %s5191_s7  ;;  %4097 = vrot.lane.b32.xlu0 %v4058_v55, %s5194_s11  ;;  %s5082_s11 = scalar_lea.vmem %s6346_s26, 128 }
 0x56c   : > { %p5083_p4 = scmp.ne.s32.totalorder %s6346_s26, %s5082_s11  ;;  %p5090_p13 = scmp.lt.s32.totalorder %s5088_s17, %s5082_s11 }
 0x56e   : > { %p5084_p3 = pnand %p5083_p4, %p5345_p5  ;;  %p5091_p0 = por %p5090_p13, %p5089_p12 }
 0x570   : > { %p5085_p9 = pneg %p5084_p3 }
 0x572   : > { %p5092_p10 = pnand %p5091_p0, %p5085_p9 }
 0x58f   : > { %v4062_v41 = vpop.permute.xlu1 %4061  ;;  %v4066_v51 = vpop.permute.xlu0 %4065 }
 0x590   : > { %v4105_v43 = vsel %vm938_vm2, %v3984_v4, %v4062_v41 }
 0x591   : > { %v4107_v56 = vsel %vm4106_vm7, %v4105_v43, %v4066_v51 }
 0x593   : > { %v4070_v30 = vpop.permute.xlu1 %4069 }
 0x594   : > { %v4109_v53 = vsel %vm4108_vm8, %v4107_v56, %v4070_v30 }
 0x5a0   : > { %v4074_v49 = vpop.permute.xlu0 %4073  ;;  %v4078_v39 = vpop.permute.xlu1 %4077 }
 0x5a1   : > { %v4111_v61 = vsel %vm4110_vm9, %v4109_v53, %v4074_v49 }
 0x5a2   : > { %v4113_v62 = vsel %vm4112_vm10, %v4111_v61, %v4078_v39 }
 0x5a4   : > { %v4082_v35 = vpop.permute.xlu0 %4081  ;;  %v4086_v54 = vpop.permute.xlu1 %4085 }
 0x5a5   : > { %v4115_v9 = vsel %vm4114_vm11, %v4113_v62, %v4082_v35 }
 0x5a6   : > { %v4117_v21 = vsel %vm4116_vm12, %v4115_v9, %v4086_v54 }
 0x5d9   : > { %v4094_v52 = vpop.permute.xlu1 %4093  ;;  %v4090_v4 = vpop.permute.xlu0 %4089 }
 0x5da   : > { %v4119_v10 = vsel %vm4118_vm13, %v4117_v21, %v4090_v4 }
 0x5db   : > { %v4121_v16 = vsel %vm4120_vm14, %v4119_v10, %v4094_v52 }
 0x5dd   : > { %v4102_v22 = vpop.permute.xlu1 %4101  ;;  %v4098_v2 = vpop.permute.xlu0 %4097 }
 0x5de   : > { %v4123_v19 = vsel %vm4122_vm15, %v4121_v16, %v4098_v2 }
 0x5df   : > { %v4125_v27 = vsel %vm4124_vm0, %v4123_v19, %v4102_v22 }
 0x5e0   : > { %v4126_v29 = vpack.c.bf16 %v4125_v27, %v4125_v27 }
 0x5e2   : > { %4718 = vmatmul.mubr.msk.bf16.vlgmr.msra.gmra.mxu0 %vm402_vm1, %v4126_v29 }
 0x6a2   : > { %v4213_v26 = vpop.f32.mrf.mxu0 }
 0x6a3   : > { %4219 = vst.msk [vmem:[%s346_s24] sm:$0xff] %vm402_vm1, %v4213_v26 }
 0x6a4   : > { %v4719_v45 = vpop.f32.mrf.mxu0 }
 0x6a5   : > { %5095 = shalt.err (!%p5092_p10)
}
 0x6a6   : > { %s5096_s13 = scalar_lea.hbm %s6344_s2, 128  ;;  %s5100_s25 = scalar_lea.hbm %s6398_s5, 256 }
 0x6a7   : > { %p5097_p11 = scmp.ne.s32.totalorder %s6344_s2, %s5096_s13  ;;  %p5101_p2 = scmp.lt.s32.totalorder %s6344_s2, %s6398_s5 }
 0x6a8   : > { %p5102_p7 = scmp.lt.s32.totalorder %s5100_s25, %s5096_s13 }
 0x6a9   : > { %p5098_p1 = pnand %p5097_p11, %p5345_p5 }
 0x6aa   : > { %p5103_p4 = por %p5102_p7, %p5101_p2 }
 0x6ab   : > { %p5099_p8 = pneg %p5098_p1 }
 0x6ad   : > { %p5104_p3 = pnand %p5103_p4, %p5099_p8 }
 0x6af   : > { %5107 = shalt.err (!%p5104_p3)
}
 0x6b0   : > { %4737 = dma.vmem_to_hbm [thread:$0]  (%p5345_p5), %s6346_s26, 128, %s6344_s2, %s4221_s3   ;;  %v4216_v60 = vpop.f32.mrf.mxu0 }
 0x6b2   : > { %v4720_v3 = vpop.f32.mrf.mxu0 }
 0x6b3 PF: > { %s4247_s28 = sand.u32 1, %s5154_s18   ;;  %p6423_p9 = scmp.ge.s32.totalorder %s5174_s23, 2 }
 0x6b4   : > { %s4248_s9 = scalar_lea.sflag [#allocation8], %s4247_s28 }
 0x6b5   : > { %p4757_p12 = pnand %p6423_p9, %p5282_p6 }
 0x6b7   : > { %p4758_p13 = pneg %p4757_p12 }
 0x6b9   : > { %5149 = dma.done.wait (%p4758_p13), %s4248_s9, 128  }
 0x6ba   : > { %5151 = vsyncadd (%p4758_p13), %s4248_s9, 4294967168  ;;  %s25_s23 = sadd.s32 1, %s5174_s23   ;;  %s6424_s18 = smov %s5158_s19 }
 0x6bb   : > { %p22_p0 = scmp.ge.s32.totalorder %s25_s23, 4   ;;  %s6425_s19 = smov %s5162_s20 }
 0x6bc   : > { %s6426_s20 = smov %s5354_s16  ;;  %s6427_s21 = smov %s5170_s22 }
 0x6bd   : > { %s6428_s22 = smov %s6430_s12  ;;  %24 = sbr.rel (!%p22_p0) target bundleno = 13 (0xd), region = 122 }
 0x6c2   :  { %4253 = vsyncpa [#allocation7], 1 }
 0x6c3   :  { %4255 = vsyncpa [#allocation7 + $0x1], 1 }
 0x6c4   :  { %4256 = vsyncpa [#allocation10], 1 }
 0x6c5   :  { %4258 = vsyncpa [#allocation10 + $0x1], 1 }
 0x6c6   :  { %4259 = vsyncpa [#allocation13], 1 }
 0x6c7   :  { %4260 = vsyncpa [#allocation8], 1 }
 0x6c8   :  { %4262 = vsyncpa [#allocation8 + $0x1], 1 }

</bundles_post_ra>
